<compile_context>
chip_gen: v7x
topology: tpu7x:2x2x1
jax: 0.10.0
libtpu: 0.0.40
codegen_flags: <defaults>
</compile_context>

<pallas_src>
import functools
import math

import jax
import jax.numpy as jnp
from jax.experimental import pallas as pl
from jax.experimental.pallas import tpu as pltpu


def _round_up(x, m):
    return (x + m - 1) // m * m


def _make_decoder_kernel(seq_len, B, input_size, H, L, Gp, NF, Hr, Cp):
    """Builds the fused GRU + head kernel (all shapes/indices static)."""

    def kernel(x_ref, h0_ref, w_ih0_ref, w_fused_ref, head_w_ref, b_ref,
               out_ref, hidden_ref):
        # ---- layer-0 input projection, hoisted off the recurrence ----------
        # (seq_len*B, input_size) @ (input_size, Gp) -> (seq_len*B, Gp)
        b_ih0 = b_ref[0:1, :Gp]
        gi0_all = jnp.dot(x_ref[...], w_ih0_ref[...],
                          preferred_element_type=jnp.float32) + b_ih0

        # Per-step fused bias (b_hh_l in the gh blocks, b_ih_l in the gi blocks
        # for l>=1).  Broadcast hoisted out of the unrolled wavefront loop
        # (JAX does not CSE broadcast_in_dim).
        b_fused = jnp.broadcast_to(b_ref[1:2, :NF], (B, NF))
        w_fused = w_fused_ref[...]                       # (L*H, NF)

        hs = [h0_ref[l] for l in range(L)]               # each (B, H)

        # ---- wavefront recurrence -------------------------------------------
        # Step s advances (layer l, timestep t = s - l) for all layers at once.
        # Layer l's input at t is layer l-1's output at t, which is exactly
        # hs[l-1] at the start of the step, so ONE fused matmul per step feeds
        # every active layer (gh for all layers + gi for layers >= 1).
        # NOTE(scaling): for seq_len >~ 48, stage gi0_all through a VMEM
        # scratch and drive this with lax.fori_loop(..., unroll=k) to bound
        # vreg live ranges; at seq_len=8 full unroll is optimal.
        for s in range(seq_len + L - 1):
            lhs = hs[0] if L == 1 else jnp.concatenate(hs, axis=1)  # (B, L*H)
            fused = jnp.dot(lhs, w_fused,
                            preferred_element_type=jnp.float32) + b_fused
            new_hs = list(hs)
            for l in range(L):
                t = s - l
                if t < 0 or t >= seq_len:
                    continue                              # layer inactive (static)
                gh = fused[:, l * Gp: l * Gp + 3 * H]
                if l == 0:
                    gi = gi0_all[t * B:(t + 1) * B, :3 * H]
                else:
                    off = (L + l - 1) * Gp
                    gi = fused[:, off: off + 3 * H]
                # r,z share one EUP dispatch; h = n + z*(h-n) drops one mul/add
                # from the serial chain.
                rz = jax.nn.sigmoid(gi[:, :2 * H] + gh[:, :2 * H])
                r, z = rz[:, :H], rz[:, H:2 * H]
                n = jnp.tanh(gi[:, 2 * H:3 * H] + r * gh[:, 2 * H:3 * H])
                new_hs[l] = n + z * (hs[l] - n)
            hs = new_hs

        for l in range(L):
            hidden_ref[l] = hs[l]

        # ---- head: out = Linear(relu(Linear(h_top at last timestep))) -------
        last = hs[L - 1]                                  # (B, H)
        fc_wT = head_w_ref[:H, :]                         # (H, Cp)
        out_wT = head_w_ref[Hr:Hr + Cp, :]                # (Cp, Cp)
        fc_b = b_ref[2:3, :Cp]
        out_b = b_ref[3:4, :Cp]
        fc = jnp.maximum(
            jnp.dot(last, fc_wT, preferred_element_type=jnp.float32) + fc_b,
            0.0)
        out_ref[...] = (
            jnp.dot(fc, out_wT, preferred_element_type=jnp.float32) + out_b)

    return kernel


def pack_decoder_params(params, *, input_size, hidden_size, num_layers,
                        fc_units, output_size):
    """One-time packing of DecoderRNN weights into the kernel layout.

    Call at init and reuse across forward calls (NOT inside the per-call jit)."""
    H, L = hidden_size, num_layers
    f32 = jnp.float32
    Gp = _round_up(3 * H, 128)          # per-layer gate block width (lanes)
    NF = (2 * L - 1) * Gp               # fused recurrence matmul output width
    Cp = _round_up(max(fc_units, output_size), 128)
    Hr = _round_up(H, 8)
    Wb = max(NF, Cp)

    w_ih0 = jnp.zeros((input_size, Gp), f32)
    w_ih0 = w_ih0.at[:, :3 * H].set(params["w_ih_l0"].T.astype(f32))

    # Fused recurrence RHS: rows l*H:(l+1)*H (multiplied by h_l) carry
    #   W_hh_l^T     in column block [l*Gp, l*Gp+3H)           -> gh_l
    #   W_ih_{l+1}^T in column block [(L+l)*Gp, (L+l)*Gp+3H)   -> gi_{l+1}
    w_fused = jnp.zeros((L * H, NF), f32)
    b_pack = jnp.zeros((4, Wb), f32)
    b_pack = b_pack.at[0, :3 * H].set(params["b_ih_l0"].astype(f32))
    for l in range(L):
        w_fused = w_fused.at[l * H:(l + 1) * H, l * Gp:l * Gp + 3 * H].set(
            params[f"w_hh_l{l}"].T.astype(f32))
        b_pack = b_pack.at[1, l * Gp:l * Gp + 3 * H].set(
            params[f"b_hh_l{l}"].astype(f32))
        if l + 1 < L:
            off = (L + l) * Gp
            w_fused = w_fused.at[l * H:(l + 1) * H, off:off + 3 * H].set(
                params[f"w_ih_l{l + 1}"].T.astype(f32))
            b_pack = b_pack.at[1, off:off + 3 * H].set(
                params[f"b_ih_l{l + 1}"].astype(f32))
    b_pack = b_pack.at[2, :fc_units].set(params["fc_b"].astype(f32))
    b_pack = b_pack.at[3, :output_size].set(params["out_b"].astype(f32))

    head_w = jnp.zeros((Hr + Cp, Cp), f32)
    head_w = head_w.at[:H, :fc_units].set(params["fc_w"].T.astype(f32))
    head_w = head_w.at[Hr:Hr + fc_units, :output_size].set(
        params["out_w"].T.astype(f32))

    return {"w_ih0": w_ih0, "w_fused": w_fused, "head_w": head_w,
            "b_pack": b_pack}


def decoder_rnn_forward(x, h0, packed, *, fc_units, output_size):
    """Pallas-backed DecoderRNN forward (inference).

    x:  (seq_len, batch, input_size) f32   (PyTorch non-batch_first layout)
    h0: (num_layers, batch, hidden_size) f32
    packed: output of pack_decoder_params (constant across calls).
    Returns (out (batch, output_size), hidden (num_layers, batch, hidden)).
    """
    f32 = jnp.float32
    seq_len, batch, input_size = x.shape
    L, _, H = h0.shape
    B = _round_up(batch, 8)
    Gp = packed["w_ih0"].shape[1]
    NF = packed["w_fused"].shape[1]
    Cp = packed["head_w"].shape[1]
    Hr = _round_up(H, 8)

    # Per-call glue: ONLY pad the batch dim to 8 sublanes (weights pre-packed).
    x = x.astype(f32)
    h0 = h0.astype(f32)
    if B != batch:
        x = jnp.pad(x, ((0, 0), (0, B - batch), (0, 0)))
        h0 = jnp.pad(h0, ((0, 0), (0, B - batch), (0, 0)))
    x_flat = x.reshape(seq_len * B, input_size)

    kernel = _make_decoder_kernel(seq_len, B, input_size, H, L, Gp, NF, Hr, Cp)

    vmem = pl.BlockSpec(memory_space=pltpu.MemorySpace.VMEM)
    out_p, hidden_p = pl.pallas_call(
        kernel,
        out_shape=(jax.ShapeDtypeStruct((B, Cp), f32),
                   jax.ShapeDtypeStruct((L, B, H), f32)),
        in_specs=[vmem] * 6,
        out_specs=(vmem, vmem),
        # Reuse the (padded) h0 HBM buffer for the hidden-state output.
        input_output_aliases={1: 1},
        # No grid: at batch<=8 the whole problem is one sublane tile; a grid /
        # megacore split would only add per-step overhead to a us-scale kernel.
    )(x_flat, h0, packed["w_ih0"], packed["w_fused"], packed["head_w"],
      packed["b_pack"])

    # Slice the sublane/lane padding back off.
    return out_p[:batch, :output_size], hidden_p[:, :batch, :]


def init_params(key, input_size, hidden_size, num_layers, fc_units, output_size):
    """Deterministic PyTorch-style uniform init U(-1/sqrt(fan), 1/sqrt(fan))."""
    params = {}
    k = key
    stdv = 1.0 / math.sqrt(hidden_size)
    for l in range(num_layers):
        in_dim = input_size if l == 0 else hidden_size
        k, k1, k2, k3, k4 = jax.random.split(k, 5)
        params[f"w_ih_l{l}"] = jax.random.uniform(
            k1, (3 * hidden_size, in_dim), jnp.float32, -stdv, stdv)
        params[f"w_hh_l{l}"] = jax.random.uniform(
            k2, (3 * hidden_size, hidden_size), jnp.float32, -stdv, stdv)
        params[f"b_ih_l{l}"] = jax.random.uniform(
            k3, (3 * hidden_size,), jnp.float32, -stdv, stdv)
        params[f"b_hh_l{l}"] = jax.random.uniform(
            k4, (3 * hidden_size,), jnp.float32, -stdv, stdv)
    k, k1, k2, k3, k4 = jax.random.split(k, 5)
    s_fc = 1.0 / math.sqrt(hidden_size)
    params["fc_w"] = jax.random.uniform(k1, (fc_units, hidden_size), jnp.float32, -s_fc, s_fc)
    params["fc_b"] = jax.random.uniform(k2, (fc_units,), jnp.float32, -s_fc, s_fc)
    s_out = 1.0 / math.sqrt(fc_units)
    params["out_w"] = jax.random.uniform(k3, (output_size, fc_units), jnp.float32, -s_out, s_out)
    params["out_b"] = jax.random.uniform(k4, (output_size,), jnp.float32, -s_out, s_out)
    return params


def decoder_rnn_reference(x, h0, params, *, fc_units, output_size):
    """Pure-JAX reference (mirrors PyTorch nn.GRU eval semantics)."""
    seq_len, batch, _ = x.shape
    num_layers, _, H = h0.shape
    layer_in = x
    hiddens = []
    for l in range(num_layers):
        w_ih, w_hh = params[f"w_ih_l{l}"], params[f"w_hh_l{l}"]
        b_ih, b_hh = params[f"b_ih_l{l}"], params[f"b_hh_l{l}"]
        h = h0[l]
        outs = []
        for t in range(seq_len):
            gi = layer_in[t] @ w_ih.T + b_ih
            gh = h @ w_hh.T + b_hh
            i_r, i_z, i_n = jnp.split(gi, 3, axis=-1)
            h_r, h_z, h_n = jnp.split(gh, 3, axis=-1)
            r = jax.nn.sigmoid(i_r + h_r)
            z = jax.nn.sigmoid(i_z + h_z)
            n = jnp.tanh(i_n + r * h_n)
            h = (1.0 - z) * n + z * h
            outs.append(h)
        hiddens.append(h)
        layer_in = jnp.stack(outs, axis=0)
    fc = jax.nn.relu(layer_in[-1] @ params["fc_w"].T + params["fc_b"])
    out = fc @ params["out_w"].T + params["out_b"]
    return out, jnp.stack(hiddens, axis=0)


if __name__ == "__main__":
    seq_len, batch = 8, 4
    input_size, hidden_size = 16, 32
    num_layers, fc_units, output_size = 2, 32, 8

    key = jax.random.PRNGKey(0)
    k_x, k_h, k_p = jax.random.split(key, 3)
    x = jax.random.normal(k_x, (seq_len, batch, input_size), jnp.float32)
    h0 = jax.random.normal(k_h, (num_layers, batch, hidden_size), jnp.float32)
    params = init_params(k_p, input_size, hidden_size, num_layers, fc_units, output_size)

    # One-time weight packing, outside the jitted per-call path.
    packed = pack_decoder_params(params, input_size=input_size,
                                 hidden_size=hidden_size, num_layers=num_layers,
                                 fc_units=fc_units, output_size=output_size)

    fwd = jax.jit(functools.partial(decoder_rnn_forward,
                                    fc_units=fc_units, output_size=output_size))
    out, hidden = jax.block_until_ready(fwd(x, h0, packed))

    ref_out, ref_hidden = decoder_rnn_reference(
        x, h0, params, fc_units=fc_units, output_size=output_size)
    assert jnp.allclose(out, ref_out, atol=1e-5, rtol=1e-5), \
        float(jnp.max(jnp.abs(out - ref_out)))
    assert jnp.allclose(hidden, ref_hidden, atol=1e-5, rtol=1e-5), \
        float(jnp.max(jnp.abs(hidden - ref_hidden)))

    print("KERNEL_OK")
</pallas_src>

<mosaic_0001>
module attributes {stable_mosaic.version = 11 : i64} {
  func.func @kernel(%arg0: memref<64x16xf32, #tpu.memory_space<vmem>>, %arg1: memref<2x8x32xf32, #tpu.memory_space<vmem>>, %arg2: memref<16x128xf32, #tpu.memory_space<vmem>>, %arg3: memref<64x384xf32, #tpu.memory_space<vmem>>, %arg4: memref<160x128xf32, #tpu.memory_space<vmem>>, %arg5: memref<4x384xf32, #tpu.memory_space<vmem>>, %arg6: memref<8x128xf32, #tpu.memory_space<vmem>>, %arg7: memref<2x8x32xf32, #tpu.memory_space<vmem>>) attributes {dimension_semantics = [], scalar_prefetch = 0 : i64, scratch_operands = 0 : i64, tpu.core_type = #tpu.core_type<tc>} {
    %c0 = arith.constant 0 : index
    %c0_0 = arith.constant 0 : index
    %0 = vector.load %arg5[%c0, %c0_0] : memref<4x384xf32, #tpu.memory_space<vmem>>, vector<1x128xf32>
    %c0_1 = arith.constant 0 : index
    %c0_2 = arith.constant 0 : index
    %1 = vector.load %arg0[%c0_1, %c0_2] : memref<64x16xf32, #tpu.memory_space<vmem>>, vector<64x16xf32>
    %c0_3 = arith.constant 0 : index
    %c0_4 = arith.constant 0 : index
    %2 = vector.load %arg2[%c0_3, %c0_4] : memref<16x128xf32, #tpu.memory_space<vmem>>, vector<16x128xf32>
    %cst = arith.constant dense<0.000000e+00> : vector<64x128xf32>
    %3 = tpu.matmul %1, %2, %cst {dimension_numbers = #tpu.dot_dimension_numbers<[1], [0], [0], [1], [0, 0, 1, 1], [], []>} : vector<64x16xf32>, vector<16x128xf32>, vector<64x128xf32> -> vector<64x128xf32>
    %4 = vector.broadcast %0 : vector<1x128xf32> to vector<64x128xf32>
    %5 = arith.addf %3, %4 : vector<64x128xf32>
    %c1 = arith.constant 1 : index
    %c0_5 = arith.constant 0 : index
    %6 = vector.load %arg5[%c1, %c0_5] : memref<4x384xf32, #tpu.memory_space<vmem>>, vector<1x384xf32>
    %7 = vector.shape_cast %6 : vector<1x384xf32> to vector<1x384xf32>
    %8 = vector.broadcast %7 : vector<1x384xf32> to vector<8x384xf32>
    %c0_6 = arith.constant 0 : index
    %c0_7 = arith.constant 0 : index
    %9 = vector.load %arg3[%c0_6, %c0_7] : memref<64x384xf32, #tpu.memory_space<vmem>>, vector<64x384xf32>
    %c0_8 = arith.constant 0 : index
    %c0_9 = arith.constant 0 : index
    %c0_10 = arith.constant 0 : index
    %10 = vector.load %arg1[%c0_8, %c0_9, %c0_10] : memref<2x8x32xf32, #tpu.memory_space<vmem>>, vector<1x8x32xf32>
    %11 = vector.shape_cast %10 : vector<1x8x32xf32> to vector<8x32xf32>
    %c1_11 = arith.constant 1 : index
    %c0_12 = arith.constant 0 : index
    %c0_13 = arith.constant 0 : index
    %12 = vector.load %arg1[%c1_11, %c0_12, %c0_13] : memref<2x8x32xf32, #tpu.memory_space<vmem>>, vector<1x8x32xf32>
    %13 = vector.shape_cast %12 : vector<1x8x32xf32> to vector<8x32xf32>
    %14 = tpu.concatenate %11, %13 in 1 : vector<8x32xf32>, vector<8x32xf32> -> vector<8x64xf32>
    %cst_14 = arith.constant dense<0.000000e+00> : vector<8x384xf32>
    %15 = tpu.matmul %14, %9, %cst_14 {dimension_numbers = #tpu.dot_dimension_numbers<[1], [0], [0], [1], [0, 0, 1, 1], [], []>} : vector<8x64xf32>, vector<64x384xf32>, vector<8x384xf32> -> vector<8x384xf32>
    %16 = arith.addf %15, %8 : vector<8x384xf32>
    %17 = vector.extract_strided_slice %16 {offsets = [0, 0], sizes = [8, 96], strides = [1, 1]} : vector<8x384xf32> to vector<8x96xf32>
    %18 = vector.extract_strided_slice %5 {offsets = [0, 0], sizes = [8, 96], strides = [1, 1]} : vector<64x128xf32> to vector<8x96xf32>
    %19 = vector.extract_strided_slice %18 {offsets = [0, 0], sizes = [8, 64], strides = [1, 1]} : vector<8x96xf32> to vector<8x64xf32>
    %20 = vector.extract_strided_slice %17 {offsets = [0, 0], sizes = [8, 64], strides = [1, 1]} : vector<8x96xf32> to vector<8x64xf32>
    %21 = arith.addf %19, %20 : vector<8x64xf32>
    %22 = arith.negf %21 : vector<8x64xf32>
    %23 = math.exp %22 : vector<8x64xf32>
    %cst_15 = arith.constant 1.000000e+00 : f32
    %24 = vector.broadcast %cst_15 : f32 to vector<8x64xf32>
    %25 = arith.addf %24, %23 : vector<8x64xf32>
    %26 = arith.divf %24, %25 : vector<8x64xf32>
    %27 = vector.extract_strided_slice %26 {offsets = [0, 0], sizes = [8, 32], strides = [1, 1]} : vector<8x64xf32> to vector<8x32xf32>
    %28 = vector.extract_strided_slice %26 {offsets = [0, 32], sizes = [8, 32], strides = [1, 1]} : vector<8x64xf32> to vector<8x32xf32>
    %29 = vector.extract_strided_slice %18 {offsets = [0, 64], sizes = [8, 32], strides = [1, 1]} : vector<8x96xf32> to vector<8x32xf32>
    %30 = vector.extract_strided_slice %17 {offsets = [0, 64], sizes = [8, 32], strides = [1, 1]} : vector<8x96xf32> to vector<8x32xf32>
    %31 = arith.mulf %27, %30 : vector<8x32xf32>
    %32 = arith.addf %29, %31 : vector<8x32xf32>
    %33 = math.tanh %32 : vector<8x32xf32>
    %34 = arith.subf %11, %33 : vector<8x32xf32>
    %35 = arith.mulf %28, %34 : vector<8x32xf32>
    %36 = arith.addf %33, %35 : vector<8x32xf32>
    %37 = tpu.concatenate %36, %13 in 1 : vector<8x32xf32>, vector<8x32xf32> -> vector<8x64xf32>
    %cst_16 = arith.constant dense<0.000000e+00> : vector<8x384xf32>
    %38 = tpu.matmul %37, %9, %cst_16 {dimension_numbers = #tpu.dot_dimension_numbers<[1], [0], [0], [1], [0, 0, 1, 1], [], []>} : vector<8x64xf32>, vector<64x384xf32>, vector<8x384xf32> -> vector<8x384xf32>
    %39 = arith.addf %38, %8 : vector<8x384xf32>
    %40 = vector.extract_strided_slice %39 {offsets = [0, 0], sizes = [8, 96], strides = [1, 1]} : vector<8x384xf32> to vector<8x96xf32>
    %41 = vector.extract_strided_slice %5 {offsets = [8, 0], sizes = [8, 96], strides = [1, 1]} : vector<64x128xf32> to vector<8x96xf32>
    %42 = vector.extract_strided_slice %41 {offsets = [0, 0], sizes = [8, 64], strides = [1, 1]} : vector<8x96xf32> to vector<8x64xf32>
    %43 = vector.extract_strided_slice %40 {offsets = [0, 0], sizes = [8, 64], strides = [1, 1]} : vector<8x96xf32> to vector<8x64xf32>
    %44 = arith.addf %42, %43 : vector<8x64xf32>
    %45 = arith.negf %44 : vector<8x64xf32>
    %46 = math.exp %45 : vector<8x64xf32>
    %cst_17 = arith.constant 1.000000e+00 : f32
    %47 = vector.broadcast %cst_17 : f32 to vector<8x64xf32>
    %48 = arith.addf %47, %46 : vector<8x64xf32>
    %49 = arith.divf %47, %48 : vector<8x64xf32>
    %50 = vector.extract_strided_slice %49 {offsets = [0, 0], sizes = [8, 32], strides = [1, 1]} : vector<8x64xf32> to vector<8x32xf32>
    %51 = vector.extract_strided_slice %49 {offsets = [0, 32], sizes = [8, 32], strides = [1, 1]} : vector<8x64xf32> to vector<8x32xf32>
    %52 = vector.extract_strided_slice %41 {offsets = [0, 64], sizes = [8, 32], strides = [1, 1]} : vector<8x96xf32> to vector<8x32xf32>
    %53 = vector.extract_strided_slice %40 {offsets = [0, 64], sizes = [8, 32], strides = [1, 1]} : vector<8x96xf32> to vector<8x32xf32>
    %54 = arith.mulf %50, %53 : vector<8x32xf32>
    %55 = arith.addf %52, %54 : vector<8x32xf32>
    %56 = math.tanh %55 : vector<8x32xf32>
    %57 = arith.subf %36, %56 : vector<8x32xf32>
    %58 = arith.mulf %51, %57 : vector<8x32xf32>
    %59 = arith.addf %56, %58 : vector<8x32xf32>
    %60 = vector.extract_strided_slice %39 {offsets = [0, 128], sizes = [8, 96], strides = [1, 1]} : vector<8x384xf32> to vector<8x96xf32>
    %61 = vector.extract_strided_slice %39 {offsets = [0, 256], sizes = [8, 96], strides = [1, 1]} : vector<8x384xf32> to vector<8x96xf32>
    %62 = vector.extract_strided_slice %61 {offsets = [0, 0], sizes = [8, 64], strides = [1, 1]} : vector<8x96xf32> to vector<8x64xf32>
    %63 = vector.extract_strided_slice %60 {offsets = [0, 0], sizes = [8, 64], strides = [1, 1]} : vector<8x96xf32> to vector<8x64xf32>
    %64 = arith.addf %62, %63 : vector<8x64xf32>
    %65 = arith.negf %64 : vector<8x64xf32>
    %66 = math.exp %65 : vector<8x64xf32>
    %cst_18 = arith.constant 1.000000e+00 : f32
    %67 = vector.broadcast %cst_18 : f32 to vector<8x64xf32>
    %68 = arith.addf %67, %66 : vector<8x64xf32>
    %69 = arith.divf %67, %68 : vector<8x64xf32>
    %70 = vector.extract_strided_slice %69 {offsets = [0, 0], sizes = [8, 32], strides = [1, 1]} : vector<8x64xf32> to vector<8x32xf32>
    %71 = vector.extract_strided_slice %69 {offsets = [0, 32], sizes = [8, 32], strides = [1, 1]} : vector<8x64xf32> to vector<8x32xf32>
    %72 = vector.extract_strided_slice %61 {offsets = [0, 64], sizes = [8, 32], strides = [1, 1]} : vector<8x96xf32> to vector<8x32xf32>
    %73 = vector.extract_strided_slice %60 {offsets = [0, 64], sizes = [8, 32], strides = [1, 1]} : vector<8x96xf32> to vector<8x32xf32>
    %74 = arith.mulf %70, %73 : vector<8x32xf32>
    %75 = arith.addf %72, %74 : vector<8x32xf32>
    %76 = math.tanh %75 : vector<8x32xf32>
    %77 = arith.subf %13, %76 : vector<8x32xf32>
    %78 = arith.mulf %71, %77 : vector<8x32xf32>
    %79 = arith.addf %76, %78 : vector<8x32xf32>
    %80 = tpu.concatenate %59, %79 in 1 : vector<8x32xf32>, vector<8x32xf32> -> vector<8x64xf32>
    %cst_19 = arith.constant dense<0.000000e+00> : vector<8x384xf32>
    %81 = tpu.matmul %80, %9, %cst_19 {dimension_numbers = #tpu.dot_dimension_numbers<[1], [0], [0], [1], [0, 0, 1, 1], [], []>} : vector<8x64xf32>, vector<64x384xf32>, vector<8x384xf32> -> vector<8x384xf32>
    %82 = arith.addf %81, %8 : vector<8x384xf32>
    %83 = vector.extract_strided_slice %82 {offsets = [0, 0], sizes = [8, 96], strides = [1, 1]} : vector<8x384xf32> to vector<8x96xf32>
    %84 = vector.extract_strided_slice %5 {offsets = [16, 0], sizes = [8, 96], strides = [1, 1]} : vector<64x128xf32> to vector<8x96xf32>
    %85 = vector.extract_strided_slice %84 {offsets = [0, 0], sizes = [8, 64], strides = [1, 1]} : vector<8x96xf32> to vector<8x64xf32>
    %86 = vector.extract_strided_slice %83 {offsets = [0, 0], sizes = [8, 64], strides = [1, 1]} : vector<8x96xf32> to vector<8x64xf32>
    %87 = arith.addf %85, %86 : vector<8x64xf32>
    %88 = arith.negf %87 : vector<8x64xf32>
    %89 = math.exp %88 : vector<8x64xf32>
    %cst_20 = arith.constant 1.000000e+00 : f32
    %90 = vector.broadcast %cst_20 : f32 to vector<8x64xf32>
    %91 = arith.addf %90, %89 : vector<8x64xf32>
    %92 = arith.divf %90, %91 : vector<8x64xf32>
    %93 = vector.extract_strided_slice %92 {offsets = [0, 0], sizes = [8, 32], strides = [1, 1]} : vector<8x64xf32> to vector<8x32xf32>
    %94 = vector.extract_strided_slice %92 {offsets = [0, 32], sizes = [8, 32], strides = [1, 1]} : vector<8x64xf32> to vector<8x32xf32>
    %95 = vector.extract_strided_slice %84 {offsets = [0, 64], sizes = [8, 32], strides = [1, 1]} : vector<8x96xf32> to vector<8x32xf32>
    %96 = vector.extract_strided_slice %83 {offsets = [0, 64], sizes = [8, 32], strides = [1, 1]} : vector<8x96xf32> to vector<8x32xf32>
    %97 = arith.mulf %93, %96 : vector<8x32xf32>
    %98 = arith.addf %95, %97 : vector<8x32xf32>
    %99 = math.tanh %98 : vector<8x32xf32>
    %100 = arith.subf %59, %99 : vector<8x32xf32>
    %101 = arith.mulf %94, %100 : vector<8x32xf32>
    %102 = arith.addf %99, %101 : vector<8x32xf32>
    %103 = vector.extract_strided_slice %82 {offsets = [0, 128], sizes = [8, 96], strides = [1, 1]} : vector<8x384xf32> to vector<8x96xf32>
    %104 = vector.extract_strided_slice %82 {offsets = [0, 256], sizes = [8, 96], strides = [1, 1]} : vector<8x384xf32> to vector<8x96xf32>
    %105 = vector.extract_strided_slice %104 {offsets = [0, 0], sizes = [8, 64], strides = [1, 1]} : vector<8x96xf32> to vector<8x64xf32>
    %106 = vector.extract_strided_slice %103 {offsets = [0, 0], sizes = [8, 64], strides = [1, 1]} : vector<8x96xf32> to vector<8x64xf32>
    %107 = arith.addf %105, %106 : vector<8x64xf32>
    %108 = arith.negf %107 : vector<8x64xf32>
    %109 = math.exp %108 : vector<8x64xf32>
    %cst_21 = arith.constant 1.000000e+00 : f32
    %110 = vector.broadcast %cst_21 : f32 to vector<8x64xf32>
    %111 = arith.addf %110, %109 : vector<8x64xf32>
    %112 = arith.divf %110, %111 : vector<8x64xf32>
    %113 = vector.extract_strided_slice %112 {offsets = [0, 0], sizes = [8, 32], strides = [1, 1]} : vector<8x64xf32> to vector<8x32xf32>
    %114 = vector.extract_strided_slice %112 {offsets = [0, 32], sizes = [8, 32], strides = [1, 1]} : vector<8x64xf32> to vector<8x32xf32>
    %115 = vector.extract_strided_slice %104 {offsets = [0, 64], sizes = [8, 32], strides = [1, 1]} : vector<8x96xf32> to vector<8x32xf32>
    %116 = vector.extract_strided_slice %103 {offsets = [0, 64], sizes = [8, 32], strides = [1, 1]} : vector<8x96xf32> to vector<8x32xf32>
    %117 = arith.mulf %113, %116 : vector<8x32xf32>
    %118 = arith.addf %115, %117 : vector<8x32xf32>
    %119 = math.tanh %118 : vector<8x32xf32>
    %120 = arith.subf %79, %119 : vector<8x32xf32>
    %121 = arith.mulf %114, %120 : vector<8x32xf32>
    %122 = arith.addf %119, %121 : vector<8x32xf32>
    %123 = tpu.concatenate %102, %122 in 1 : vector<8x32xf32>, vector<8x32xf32> -> vector<8x64xf32>
    %cst_22 = arith.constant dense<0.000000e+00> : vector<8x384xf32>
    %124 = tpu.matmul %123, %9, %cst_22 {dimension_numbers = #tpu.dot_dimension_numbers<[1], [0], [0], [1], [0, 0, 1, 1], [], []>} : vector<8x64xf32>, vector<64x384xf32>, vector<8x384xf32> -> vector<8x384xf32>
    %125 = arith.addf %124, %8 : vector<8x384xf32>
    %126 = vector.extract_strided_slice %125 {offsets = [0, 0], sizes = [8, 96], strides = [1, 1]} : vector<8x384xf32> to vector<8x96xf32>
    %127 = vector.extract_strided_slice %5 {offsets = [24, 0], sizes = [8, 96], strides = [1, 1]} : vector<64x128xf32> to vector<8x96xf32>
    %128 = vector.extract_strided_slice %127 {offsets = [0, 0], sizes = [8, 64], strides = [1, 1]} : vector<8x96xf32> to vector<8x64xf32>
    %129 = vector.extract_strided_slice %126 {offsets = [0, 0], sizes = [8, 64], strides = [1, 1]} : vector<8x96xf32> to vector<8x64xf32>
    %130 = arith.addf %128, %129 : vector<8x64xf32>
    %131 = arith.negf %130 : vector<8x64xf32>
    %132 = math.exp %131 : vector<8x64xf32>
    %cst_23 = arith.constant 1.000000e+00 : f32
    %133 = vector.broadcast %cst_23 : f32 to vector<8x64xf32>
    %134 = arith.addf %133, %132 : vector<8x64xf32>
    %135 = arith.divf %133, %134 : vector<8x64xf32>
    %136 = vector.extract_strided_slice %135 {offsets = [0, 0], sizes = [8, 32], strides = [1, 1]} : vector<8x64xf32> to vector<8x32xf32>
    %137 = vector.extract_strided_slice %135 {offsets = [0, 32], sizes = [8, 32], strides = [1, 1]} : vector<8x64xf32> to vector<8x32xf32>
    %138 = vector.extract_strided_slice %127 {offsets = [0, 64], sizes = [8, 32], strides = [1, 1]} : vector<8x96xf32> to vector<8x32xf32>
    %139 = vector.extract_strided_slice %126 {offsets = [0, 64], sizes = [8, 32], strides = [1, 1]} : vector<8x96xf32> to vector<8x32xf32>
    %140 = arith.mulf %136, %139 : vector<8x32xf32>
    %141 = arith.addf %138, %140 : vector<8x32xf32>
    %142 = math.tanh %141 : vector<8x32xf32>
    %143 = arith.subf %102, %142 : vector<8x32xf32>
    %144 = arith.mulf %137, %143 : vector<8x32xf32>
    %145 = arith.addf %142, %144 : vector<8x32xf32>
    %146 = vector.extract_strided_slice %125 {offsets = [0, 128], sizes = [8, 96], strides = [1, 1]} : vector<8x384xf32> to vector<8x96xf32>
    %147 = vector.extract_strided_slice %125 {offsets = [0, 256], sizes = [8, 96], strides = [1, 1]} : vector<8x384xf32> to vector<8x96xf32>
    %148 = vector.extract_strided_slice %147 {offsets = [0, 0], sizes = [8, 64], strides = [1, 1]} : vector<8x96xf32> to vector<8x64xf32>
    %149 = vector.extract_strided_slice %146 {offsets = [0, 0], sizes = [8, 64], strides = [1, 1]} : vector<8x96xf32> to vector<8x64xf32>
    %150 = arith.addf %148, %149 : vector<8x64xf32>
    %151 = arith.negf %150 : vector<8x64xf32>
    %152 = math.exp %151 : vector<8x64xf32>
    %cst_24 = arith.constant 1.000000e+00 : f32
    %153 = vector.broadcast %cst_24 : f32 to vector<8x64xf32>
    %154 = arith.addf %153, %152 : vector<8x64xf32>
    %155 = arith.divf %153, %154 : vector<8x64xf32>
    %156 = vector.extract_strided_slice %155 {offsets = [0, 0], sizes = [8, 32], strides = [1, 1]} : vector<8x64xf32> to vector<8x32xf32>
    %157 = vector.extract_strided_slice %155 {offsets = [0, 32], sizes = [8, 32], strides = [1, 1]} : vector<8x64xf32> to vector<8x32xf32>
    %158 = vector.extract_strided_slice %147 {offsets = [0, 64], sizes = [8, 32], strides = [1, 1]} : vector<8x96xf32> to vector<8x32xf32>
    %159 = vector.extract_strided_slice %146 {offsets = [0, 64], sizes = [8, 32], strides = [1, 1]} : vector<8x96xf32> to vector<8x32xf32>
    %160 = arith.mulf %156, %159 : vector<8x32xf32>
    %161 = arith.addf %158, %160 : vector<8x32xf32>
    %162 = math.tanh %161 : vector<8x32xf32>
    %163 = arith.subf %122, %162 : vector<8x32xf32>
    %164 = arith.mulf %157, %163 : vector<8x32xf32>
    %165 = arith.addf %162, %164 : vector<8x32xf32>
    %166 = tpu.concatenate %145, %165 in 1 : vector<8x32xf32>, vector<8x32xf32> -> vector<8x64xf32>
    %cst_25 = arith.constant dense<0.000000e+00> : vector<8x384xf32>
    %167 = tpu.matmul %166, %9, %cst_25 {dimension_numbers = #tpu.dot_dimension_numbers<[1], [0], [0], [1], [0, 0, 1, 1], [], []>} : vector<8x64xf32>, vector<64x384xf32>, vector<8x384xf32> -> vector<8x384xf32>
    %168 = arith.addf %167, %8 : vector<8x384xf32>
    %169 = vector.extract_strided_slice %168 {offsets = [0, 0], sizes = [8, 96], strides = [1, 1]} : vector<8x384xf32> to vector<8x96xf32>
    %170 = vector.extract_strided_slice %5 {offsets = [32, 0], sizes = [8, 96], strides = [1, 1]} : vector<64x128xf32> to vector<8x96xf32>
    %171 = vector.extract_strided_slice %170 {offsets = [0, 0], sizes = [8, 64], strides = [1, 1]} : vector<8x96xf32> to vector<8x64xf32>
    %172 = vector.extract_strided_slice %169 {offsets = [0, 0], sizes = [8, 64], strides = [1, 1]} : vector<8x96xf32> to vector<8x64xf32>
    %173 = arith.addf %171, %172 : vector<8x64xf32>
    %174 = arith.negf %173 : vector<8x64xf32>
    %175 = math.exp %174 : vector<8x64xf32>
    %cst_26 = arith.constant 1.000000e+00 : f32
    %176 = vector.broadcast %cst_26 : f32 to vector<8x64xf32>
    %177 = arith.addf %176, %175 : vector<8x64xf32>
    %178 = arith.divf %176, %177 : vector<8x64xf32>
    %179 = vector.extract_strided_slice %178 {offsets = [0, 0], sizes = [8, 32], strides = [1, 1]} : vector<8x64xf32> to vector<8x32xf32>
    %180 = vector.extract_strided_slice %178 {offsets = [0, 32], sizes = [8, 32], strides = [1, 1]} : vector<8x64xf32> to vector<8x32xf32>
    %181 = vector.extract_strided_slice %170 {offsets = [0, 64], sizes = [8, 32], strides = [1, 1]} : vector<8x96xf32> to vector<8x32xf32>
    %182 = vector.extract_strided_slice %169 {offsets = [0, 64], sizes = [8, 32], strides = [1, 1]} : vector<8x96xf32> to vector<8x32xf32>
    %183 = arith.mulf %179, %182 : vector<8x32xf32>
    %184 = arith.addf %181, %183 : vector<8x32xf32>
    %185 = math.tanh %184 : vector<8x32xf32>
    %186 = arith.subf %145, %185 : vector<8x32xf32>
    %187 = arith.mulf %180, %186 : vector<8x32xf32>
    %188 = arith.addf %185, %187 : vector<8x32xf32>
    %189 = vector.extract_strided_slice %168 {offsets = [0, 128], sizes = [8, 96], strides = [1, 1]} : vector<8x384xf32> to vector<8x96xf32>
    %190 = vector.extract_strided_slice %168 {offsets = [0, 256], sizes = [8, 96], strides = [1, 1]} : vector<8x384xf32> to vector<8x96xf32>
    %191 = vector.extract_strided_slice %190 {offsets = [0, 0], sizes = [8, 64], strides = [1, 1]} : vector<8x96xf32> to vector<8x64xf32>
    %192 = vector.extract_strided_slice %189 {offsets = [0, 0], sizes = [8, 64], strides = [1, 1]} : vector<8x96xf32> to vector<8x64xf32>
    %193 = arith.addf %191, %192 : vector<8x64xf32>
    %194 = arith.negf %193 : vector<8x64xf32>
    %195 = math.exp %194 : vector<8x64xf32>
    %cst_27 = arith.constant 1.000000e+00 : f32
    %196 = vector.broadcast %cst_27 : f32 to vector<8x64xf32>
    %197 = arith.addf %196, %195 : vector<8x64xf32>
    %198 = arith.divf %196, %197 : vector<8x64xf32>
    %199 = vector.extract_strided_slice %198 {offsets = [0, 0], sizes = [8, 32], strides = [1, 1]} : vector<8x64xf32> to vector<8x32xf32>
    %200 = vector.extract_strided_slice %198 {offsets = [0, 32], sizes = [8, 32], strides = [1, 1]} : vector<8x64xf32> to vector<8x32xf32>
    %201 = vector.extract_strided_slice %190 {offsets = [0, 64], sizes = [8, 32], strides = [1, 1]} : vector<8x96xf32> to vector<8x32xf32>
    %202 = vector.extract_strided_slice %189 {offsets = [0, 64], sizes = [8, 32], strides = [1, 1]} : vector<8x96xf32> to vector<8x32xf32>
    %203 = arith.mulf %199, %202 : vector<8x32xf32>
    %204 = arith.addf %201, %203 : vector<8x32xf32>
    %205 = math.tanh %204 : vector<8x32xf32>
    %206 = arith.subf %165, %205 : vector<8x32xf32>
    %207 = arith.mulf %200, %206 : vector<8x32xf32>
    %208 = arith.addf %205, %207 : vector<8x32xf32>
    %209 = tpu.concatenate %188, %208 in 1 : vector<8x32xf32>, vector<8x32xf32> -> vector<8x64xf32>
    %cst_28 = arith.constant dense<0.000000e+00> : vector<8x384xf32>
    %210 = tpu.matmul %209, %9, %cst_28 {dimension_numbers = #tpu.dot_dimension_numbers<[1], [0], [0], [1], [0, 0, 1, 1], [], []>} : vector<8x64xf32>, vector<64x384xf32>, vector<8x384xf32> -> vector<8x384xf32>
    %211 = arith.addf %210, %8 : vector<8x384xf32>
    %212 = vector.extract_strided_slice %211 {offsets = [0, 0], sizes = [8, 96], strides = [1, 1]} : vector<8x384xf32> to vector<8x96xf32>
    %213 = vector.extract_strided_slice %5 {offsets = [40, 0], sizes = [8, 96], strides = [1, 1]} : vector<64x128xf32> to vector<8x96xf32>
    %214 = vector.extract_strided_slice %213 {offsets = [0, 0], sizes = [8, 64], strides = [1, 1]} : vector<8x96xf32> to vector<8x64xf32>
    %215 = vector.extract_strided_slice %212 {offsets = [0, 0], sizes = [8, 64], strides = [1, 1]} : vector<8x96xf32> to vector<8x64xf32>
    %216 = arith.addf %214, %215 : vector<8x64xf32>
    %217 = arith.negf %216 : vector<8x64xf32>
    %218 = math.exp %217 : vector<8x64xf32>
    %cst_29 = arith.constant 1.000000e+00 : f32
    %219 = vector.broadcast %cst_29 : f32 to vector<8x64xf32>
    %220 = arith.addf %219, %218 : vector<8x64xf32>
    %221 = arith.divf %219, %220 : vector<8x64xf32>
    %222 = vector.extract_strided_slice %221 {offsets = [0, 0], sizes = [8, 32], strides = [1, 1]} : vector<8x64xf32> to vector<8x32xf32>
    %223 = vector.extract_strided_slice %221 {offsets = [0, 32], sizes = [8, 32], strides = [1, 1]} : vector<8x64xf32> to vector<8x32xf32>
    %224 = vector.extract_strided_slice %213 {offsets = [0, 64], sizes = [8, 32], strides = [1, 1]} : vector<8x96xf32> to vector<8x32xf32>
    %225 = vector.extract_strided_slice %212 {offsets = [0, 64], sizes = [8, 32], strides = [1, 1]} : vector<8x96xf32> to vector<8x32xf32>
    %226 = arith.mulf %222, %225 : vector<8x32xf32>
    %227 = arith.addf %224, %226 : vector<8x32xf32>
    %228 = math.tanh %227 : vector<8x32xf32>
    %229 = arith.subf %188, %228 : vector<8x32xf32>
    %230 = arith.mulf %223, %229 : vector<8x32xf32>
    %231 = arith.addf %228, %230 : vector<8x32xf32>
    %232 = vector.extract_strided_slice %211 {offsets = [0, 128], sizes = [8, 96], strides = [1, 1]} : vector<8x384xf32> to vector<8x96xf32>
    %233 = vector.extract_strided_slice %211 {offsets = [0, 256], sizes = [8, 96], strides = [1, 1]} : vector<8x384xf32> to vector<8x96xf32>
    %234 = vector.extract_strided_slice %233 {offsets = [0, 0], sizes = [8, 64], strides = [1, 1]} : vector<8x96xf32> to vector<8x64xf32>
    %235 = vector.extract_strided_slice %232 {offsets = [0, 0], sizes = [8, 64], strides = [1, 1]} : vector<8x96xf32> to vector<8x64xf32>
    %236 = arith.addf %234, %235 : vector<8x64xf32>
    %237 = arith.negf %236 : vector<8x64xf32>
    %238 = math.exp %237 : vector<8x64xf32>
    %cst_30 = arith.constant 1.000000e+00 : f32
    %239 = vector.broadcast %cst_30 : f32 to vector<8x64xf32>
    %240 = arith.addf %239, %238 : vector<8x64xf32>
    %241 = arith.divf %239, %240 : vector<8x64xf32>
    %242 = vector.extract_strided_slice %241 {offsets = [0, 0], sizes = [8, 32], strides = [1, 1]} : vector<8x64xf32> to vector<8x32xf32>
    %243 = vector.extract_strided_slice %241 {offsets = [0, 32], sizes = [8, 32], strides = [1, 1]} : vector<8x64xf32> to vector<8x32xf32>
    %244 = vector.extract_strided_slice %233 {offsets = [0, 64], sizes = [8, 32], strides = [1, 1]} : vector<8x96xf32> to vector<8x32xf32>
    %245 = vector.extract_strided_slice %232 {offsets = [0, 64], sizes = [8, 32], strides = [1, 1]} : vector<8x96xf32> to vector<8x32xf32>
    %246 = arith.mulf %242, %245 : vector<8x32xf32>
    %247 = arith.addf %244, %246 : vector<8x32xf32>
    %248 = math.tanh %247 : vector<8x32xf32>
    %249 = arith.subf %208, %248 : vector<8x32xf32>
    %250 = arith.mulf %243, %249 : vector<8x32xf32>
    %251 = arith.addf %248, %250 : vector<8x32xf32>
    %252 = tpu.concatenate %231, %251 in 1 : vector<8x32xf32>, vector<8x32xf32> -> vector<8x64xf32>
    %cst_31 = arith.constant dense<0.000000e+00> : vector<8x384xf32>
    %253 = tpu.matmul %252, %9, %cst_31 {dimension_numbers = #tpu.dot_dimension_numbers<[1], [0], [0], [1], [0, 0, 1, 1], [], []>} : vector<8x64xf32>, vector<64x384xf32>, vector<8x384xf32> -> vector<8x384xf32>
    %254 = arith.addf %253, %8 : vector<8x384xf32>
    %255 = vector.extract_strided_slice %254 {offsets = [0, 0], sizes = [8, 96], strides = [1, 1]} : vector<8x384xf32> to vector<8x96xf32>
    %256 = vector.extract_strided_slice %5 {offsets = [48, 0], sizes = [8, 96], strides = [1, 1]} : vector<64x128xf32> to vector<8x96xf32>
    %257 = vector.extract_strided_slice %256 {offsets = [0, 0], sizes = [8, 64], strides = [1, 1]} : vector<8x96xf32> to vector<8x64xf32>
    %258 = vector.extract_strided_slice %255 {offsets = [0, 0], sizes = [8, 64], strides = [1, 1]} : vector<8x96xf32> to vector<8x64xf32>
    %259 = arith.addf %257, %258 : vector<8x64xf32>
    %260 = arith.negf %259 : vector<8x64xf32>
    %261 = math.exp %260 : vector<8x64xf32>
    %cst_32 = arith.constant 1.000000e+00 : f32
    %262 = vector.broadcast %cst_32 : f32 to vector<8x64xf32>
    %263 = arith.addf %262, %261 : vector<8x64xf32>
    %264 = arith.divf %262, %263 : vector<8x64xf32>
    %265 = vector.extract_strided_slice %264 {offsets = [0, 0], sizes = [8, 32], strides = [1, 1]} : vector<8x64xf32> to vector<8x32xf32>
    %266 = vector.extract_strided_slice %264 {offsets = [0, 32], sizes = [8, 32], strides = [1, 1]} : vector<8x64xf32> to vector<8x32xf32>
    %267 = vector.extract_strided_slice %256 {offsets = [0, 64], sizes = [8, 32], strides = [1, 1]} : vector<8x96xf32> to vector<8x32xf32>
    %268 = vector.extract_strided_slice %255 {offsets = [0, 64], sizes = [8, 32], strides = [1, 1]} : vector<8x96xf32> to vector<8x32xf32>
    %269 = arith.mulf %265, %268 : vector<8x32xf32>
    %270 = arith.addf %267, %269 : vector<8x32xf32>
    %271 = math.tanh %270 : vector<8x32xf32>
    %272 = arith.subf %231, %271 : vector<8x32xf32>
    %273 = arith.mulf %266, %272 : vector<8x32xf32>
    %274 = arith.addf %271, %273 : vector<8x32xf32>
    %275 = vector.extract_strided_slice %254 {offsets = [0, 128], sizes = [8, 96], strides = [1, 1]} : vector<8x384xf32> to vector<8x96xf32>
    %276 = vector.extract_strided_slice %254 {offsets = [0, 256], sizes = [8, 96], strides = [1, 1]} : vector<8x384xf32> to vector<8x96xf32>
    %277 = vector.extract_strided_slice %276 {offsets = [0, 0], sizes = [8, 64], strides = [1, 1]} : vector<8x96xf32> to vector<8x64xf32>
    %278 = vector.extract_strided_slice %275 {offsets = [0, 0], sizes = [8, 64], strides = [1, 1]} : vector<8x96xf32> to vector<8x64xf32>
    %279 = arith.addf %277, %278 : vector<8x64xf32>
    %280 = arith.negf %279 : vector<8x64xf32>
    %281 = math.exp %280 : vector<8x64xf32>
    %cst_33 = arith.constant 1.000000e+00 : f32
    %282 = vector.broadcast %cst_33 : f32 to vector<8x64xf32>
    %283 = arith.addf %282, %281 : vector<8x64xf32>
    %284 = arith.divf %282, %283 : vector<8x64xf32>
    %285 = vector.extract_strided_slice %284 {offsets = [0, 0], sizes = [8, 32], strides = [1, 1]} : vector<8x64xf32> to vector<8x32xf32>
    %286 = vector.extract_strided_slice %284 {offsets = [0, 32], sizes = [8, 32], strides = [1, 1]} : vector<8x64xf32> to vector<8x32xf32>
    %287 = vector.extract_strided_slice %276 {offsets = [0, 64], sizes = [8, 32], strides = [1, 1]} : vector<8x96xf32> to vector<8x32xf32>
    %288 = vector.extract_strided_slice %275 {offsets = [0, 64], sizes = [8, 32], strides = [1, 1]} : vector<8x96xf32> to vector<8x32xf32>
    %289 = arith.mulf %285, %288 : vector<8x32xf32>
    %290 = arith.addf %287, %289 : vector<8x32xf32>
    %291 = math.tanh %290 : vector<8x32xf32>
    %292 = arith.subf %251, %291 : vector<8x32xf32>
    %293 = arith.mulf %286, %292 : vector<8x32xf32>
    %294 = arith.addf %291, %293 : vector<8x32xf32>
    %295 = tpu.concatenate %274, %294 in 1 : vector<8x32xf32>, vector<8x32xf32> -> vector<8x64xf32>
    %cst_34 = arith.constant dense<0.000000e+00> : vector<8x384xf32>
    %296 = tpu.matmul %295, %9, %cst_34 {dimension_numbers = #tpu.dot_dimension_numbers<[1], [0], [0], [1], [0, 0, 1, 1], [], []>} : vector<8x64xf32>, vector<64x384xf32>, vector<8x384xf32> -> vector<8x384xf32>
    %297 = arith.addf %296, %8 : vector<8x384xf32>
    %298 = vector.extract_strided_slice %297 {offsets = [0, 0], sizes = [8, 96], strides = [1, 1]} : vector<8x384xf32> to vector<8x96xf32>
    %299 = vector.extract_strided_slice %5 {offsets = [56, 0], sizes = [8, 96], strides = [1, 1]} : vector<64x128xf32> to vector<8x96xf32>
    %300 = vector.extract_strided_slice %299 {offsets = [0, 0], sizes = [8, 64], strides = [1, 1]} : vector<8x96xf32> to vector<8x64xf32>
    %301 = vector.extract_strided_slice %298 {offsets = [0, 0], sizes = [8, 64], strides = [1, 1]} : vector<8x96xf32> to vector<8x64xf32>
    %302 = arith.addf %300, %301 : vector<8x64xf32>
    %303 = arith.negf %302 : vector<8x64xf32>
    %304 = math.exp %303 : vector<8x64xf32>
    %cst_35 = arith.constant 1.000000e+00 : f32
    %305 = vector.broadcast %cst_35 : f32 to vector<8x64xf32>
    %306 = arith.addf %305, %304 : vector<8x64xf32>
    %307 = arith.divf %305, %306 : vector<8x64xf32>
    %308 = vector.extract_strided_slice %307 {offsets = [0, 0], sizes = [8, 32], strides = [1, 1]} : vector<8x64xf32> to vector<8x32xf32>
    %309 = vector.extract_strided_slice %307 {offsets = [0, 32], sizes = [8, 32], strides = [1, 1]} : vector<8x64xf32> to vector<8x32xf32>
    %310 = vector.extract_strided_slice %299 {offsets = [0, 64], sizes = [8, 32], strides = [1, 1]} : vector<8x96xf32> to vector<8x32xf32>
    %311 = vector.extract_strided_slice %298 {offsets = [0, 64], sizes = [8, 32], strides = [1, 1]} : vector<8x96xf32> to vector<8x32xf32>
    %312 = arith.mulf %308, %311 : vector<8x32xf32>
    %313 = arith.addf %310, %312 : vector<8x32xf32>
    %314 = math.tanh %313 : vector<8x32xf32>
    %315 = arith.subf %274, %314 : vector<8x32xf32>
    %316 = arith.mulf %309, %315 : vector<8x32xf32>
    %317 = arith.addf %314, %316 : vector<8x32xf32>
    %318 = vector.extract_strided_slice %297 {offsets = [0, 128], sizes = [8, 96], strides = [1, 1]} : vector<8x384xf32> to vector<8x96xf32>
    %319 = vector.extract_strided_slice %297 {offsets = [0, 256], sizes = [8, 96], strides = [1, 1]} : vector<8x384xf32> to vector<8x96xf32>
    %320 = vector.extract_strided_slice %319 {offsets = [0, 0], sizes = [8, 64], strides = [1, 1]} : vector<8x96xf32> to vector<8x64xf32>
    %321 = vector.extract_strided_slice %318 {offsets = [0, 0], sizes = [8, 64], strides = [1, 1]} : vector<8x96xf32> to vector<8x64xf32>
    %322 = arith.addf %320, %321 : vector<8x64xf32>
    %323 = arith.negf %322 : vector<8x64xf32>
    %324 = math.exp %323 : vector<8x64xf32>
    %cst_36 = arith.constant 1.000000e+00 : f32
    %325 = vector.broadcast %cst_36 : f32 to vector<8x64xf32>
    %326 = arith.addf %325, %324 : vector<8x64xf32>
    %327 = arith.divf %325, %326 : vector<8x64xf32>
    %328 = vector.extract_strided_slice %327 {offsets = [0, 0], sizes = [8, 32], strides = [1, 1]} : vector<8x64xf32> to vector<8x32xf32>
    %329 = vector.extract_strided_slice %327 {offsets = [0, 32], sizes = [8, 32], strides = [1, 1]} : vector<8x64xf32> to vector<8x32xf32>
    %330 = vector.extract_strided_slice %319 {offsets = [0, 64], sizes = [8, 32], strides = [1, 1]} : vector<8x96xf32> to vector<8x32xf32>
    %331 = vector.extract_strided_slice %318 {offsets = [0, 64], sizes = [8, 32], strides = [1, 1]} : vector<8x96xf32> to vector<8x32xf32>
    %332 = arith.mulf %328, %331 : vector<8x32xf32>
    %333 = arith.addf %330, %332 : vector<8x32xf32>
    %334 = math.tanh %333 : vector<8x32xf32>
    %335 = arith.subf %294, %334 : vector<8x32xf32>
    %336 = arith.mulf %329, %335 : vector<8x32xf32>
    %337 = arith.addf %334, %336 : vector<8x32xf32>
    %338 = tpu.concatenate %317, %337 in 1 : vector<8x32xf32>, vector<8x32xf32> -> vector<8x64xf32>
    %cst_37 = arith.constant dense<0.000000e+00> : vector<8x384xf32>
    %339 = tpu.matmul %338, %9, %cst_37 {dimension_numbers = #tpu.dot_dimension_numbers<[1], [0], [0], [1], [0, 0, 1, 1], [], []>} : vector<8x64xf32>, vector<64x384xf32>, vector<8x384xf32> -> vector<8x384xf32>
    %340 = arith.addf %339, %8 : vector<8x384xf32>
    %341 = vector.extract_strided_slice %340 {offsets = [0, 128], sizes = [8, 96], strides = [1, 1]} : vector<8x384xf32> to vector<8x96xf32>
    %342 = vector.extract_strided_slice %340 {offsets = [0, 256], sizes = [8, 96], strides = [1, 1]} : vector<8x384xf32> to vector<8x96xf32>
    %343 = vector.extract_strided_slice %342 {offsets = [0, 0], sizes = [8, 64], strides = [1, 1]} : vector<8x96xf32> to vector<8x64xf32>
    %344 = vector.extract_strided_slice %341 {offsets = [0, 0], sizes = [8, 64], strides = [1, 1]} : vector<8x96xf32> to vector<8x64xf32>
    %345 = arith.addf %343, %344 : vector<8x64xf32>
    %346 = arith.negf %345 : vector<8x64xf32>
    %347 = math.exp %346 : vector<8x64xf32>
    %cst_38 = arith.constant 1.000000e+00 : f32
    %348 = vector.broadcast %cst_38 : f32 to vector<8x64xf32>
    %349 = arith.addf %348, %347 : vector<8x64xf32>
    %350 = arith.divf %348, %349 : vector<8x64xf32>
    %351 = vector.extract_strided_slice %350 {offsets = [0, 0], sizes = [8, 32], strides = [1, 1]} : vector<8x64xf32> to vector<8x32xf32>
    %352 = vector.extract_strided_slice %350 {offsets = [0, 32], sizes = [8, 32], strides = [1, 1]} : vector<8x64xf32> to vector<8x32xf32>
    %353 = vector.extract_strided_slice %342 {offsets = [0, 64], sizes = [8, 32], strides = [1, 1]} : vector<8x96xf32> to vector<8x32xf32>
    %354 = vector.extract_strided_slice %341 {offsets = [0, 64], sizes = [8, 32], strides = [1, 1]} : vector<8x96xf32> to vector<8x32xf32>
    %355 = arith.mulf %351, %354 : vector<8x32xf32>
    %356 = arith.addf %353, %355 : vector<8x32xf32>
    %357 = math.tanh %356 : vector<8x32xf32>
    %358 = arith.subf %337, %357 : vector<8x32xf32>
    %359 = arith.mulf %352, %358 : vector<8x32xf32>
    %360 = arith.addf %357, %359 : vector<8x32xf32>
    %c0_39 = arith.constant 0 : index
    %c0_40 = arith.constant 0 : index
    %c0_41 = arith.constant 0 : index
    %361 = vector.load %arg7[%c0_39, %c0_40, %c0_41] : memref<2x8x32xf32, #tpu.memory_space<vmem>>, vector<1x8x32xf32>
    %362 = vector.shape_cast %361 : vector<1x8x32xf32> to vector<8x32xf32>
    %363 = vector.shape_cast %317 : vector<8x32xf32> to vector<1x8x32xf32>
    tpu.vector_store %arg7[%c0_39, %c0_40, %c0_41], %363 {strides = array<i32>} : memref<2x8x32xf32, #tpu.memory_space<vmem>>, vector<1x8x32xf32>,
    %c1_42 = arith.constant 1 : index
    %c0_43 = arith.constant 0 : index
    %c0_44 = arith.constant 0 : index
    %364 = vector.load %arg7[%c1_42, %c0_43, %c0_44] : memref<2x8x32xf32, #tpu.memory_space<vmem>>, vector<1x8x32xf32>
    %365 = vector.shape_cast %364 : vector<1x8x32xf32> to vector<8x32xf32>
    %366 = vector.shape_cast %360 : vector<8x32xf32> to vector<1x8x32xf32>
    tpu.vector_store %arg7[%c1_42, %c0_43, %c0_44], %366 {strides = array<i32>} : memref<2x8x32xf32, #tpu.memory_space<vmem>>, vector<1x8x32xf32>,
    %c0_45 = arith.constant 0 : index
    %c0_46 = arith.constant 0 : index
    %367 = vector.load %arg4[%c0_45, %c0_46] : memref<160x128xf32, #tpu.memory_space<vmem>>, vector<32x128xf32>
    %c32 = arith.constant 32 : index
    %c0_47 = arith.constant 0 : index
    %368 = vector.load %arg4[%c32, %c0_47] : memref<160x128xf32, #tpu.memory_space<vmem>>, vector<128x128xf32>
    %c2 = arith.constant 2 : index
    %c0_48 = arith.constant 0 : index
    %369 = vector.load %arg5[%c2, %c0_48] : memref<4x384xf32, #tpu.memory_space<vmem>>, vector<1x128xf32>
    %c3 = arith.constant 3 : index
    %c0_49 = arith.constant 0 : index
    %370 = vector.load %arg5[%c3, %c0_49] : memref<4x384xf32, #tpu.memory_space<vmem>>, vector<1x128xf32>
    %cst_50 = arith.constant dense<0.000000e+00> : vector<8x128xf32>
    %371 = tpu.matmul %360, %367, %cst_50 {dimension_numbers = #tpu.dot_dimension_numbers<[1], [0], [0], [1], [0, 0, 1, 1], [], []>} : vector<8x32xf32>, vector<32x128xf32>, vector<8x128xf32> -> vector<8x128xf32>
    %372 = vector.broadcast %369 : vector<1x128xf32> to vector<8x128xf32>
    %373 = arith.addf %371, %372 : vector<8x128xf32>
    %cst_51 = arith.constant 0.000000e+00 : f32
    %374 = vector.broadcast %cst_51 : f32 to vector<8x128xf32>
    %375 = arith.maximumf %373, %374 : vector<8x128xf32>
    %cst_52 = arith.constant dense<0.000000e+00> : vector<8x128xf32>
    %376 = tpu.matmul %375, %368, %cst_52 {dimension_numbers = #tpu.dot_dimension_numbers<[1], [0], [0], [1], [0, 0, 1, 1], [], []>} : vector<8x128xf32>, vector<128x128xf32>, vector<8x128xf32> -> vector<8x128xf32>
    %377 = vector.broadcast %370 : vector<1x128xf32> to vector<8x128xf32>
    %378 = arith.addf %376, %377 : vector<8x128xf32>
    %c0_53 = arith.constant 0 : index
    %c0_54 = arith.constant 0 : index
    %379 = vector.load %arg6[%c0_53, %c0_54] : memref<8x128xf32, #tpu.memory_space<vmem>>, vector<8x128xf32>
    tpu.vector_store %arg6[%c0_53, %c0_54], %378 {strides = array<i32>} : memref<8x128xf32, #tpu.memory_space<vmem>>, vector<8x128xf32>,
    return
  }
}

</mosaic_0001>

<bundles_post_ra>
// kernel: decoder_rnn_forward.1
= control target key start
LH: loop header
LB: loop body
LE: loop exit
PB: predicated region body
PF: predicated region fallthrough
CT: control target
= control target key end

     0   :  { %13 = vsyncpa [#allocation3], 0  ;;  %s3580_s0 = inlined_call_operand.vmem [shape: f32[64,16], index: 0, kind: input, shape index: {}]   ;;  %s3581_s1 = inlined_call_operand.vmem [shape: f32[2,8,32], index: 1, kind: input, shape index: {}, may-alias: {1,7}]   ;;  %s3582_s2 = inlined_call_operand.vmem [shape: f32[16,128], index: 2, kind: input, shape index: {}]   ;;  %s3583_s3 = inlined_call_operand.hbm [shape: f32[64,384], index: 3, kind: input, shape index: {}]   ;;  %s3584_s4 = inlined_call_operand.hbm [shape: f32[160,128], index: 4, kind: input, shape index: {}]   ;;  %s3585_s5 = inlined_call_operand.vmem [shape: f32[4,384], index: 5, kind: input, shape index: {}]   ;;  %s3586_s6 = inlined_call_operand.vmem [shape: f32[8,128], index: 6, kind: output, shape index: {0}]   ;;  %s3587_s7 = inlined_call_operand.vmem [shape: f32[2,8,32], index: 7, kind: output, shape index: {1}, may-alias: {1,7}]  }
   0x1   :  { %14 = vsyncpa [#allocation5], 0  ;;  %s3002_s24 = smov [#allocation2]   ;;  %s2954_s28 = scalar_lea.hbm %s3583_s3, 3072 }
   0x2   :  { %s26_s25 = sshll.u32 %s3002_s24, 4  ;;  %p2955_p0 = scmp.ne.s32.totalorder %s3583_s3, %s2954_s28  ;;  %s27_s25 = int_to_ptr.vmem [resolvable:$true] %s26_s25 }
   0x3   :  { %p2958_p1 = scmp.lt.u32.totalorder %s2954_s28, %s3583_s3 }
   0x5   :  { %p2960_p2 = pnand %p2958_p1, %p2955_p0 }
   0x7   :  { %2963 = shalt.err (!%p2960_p2)
}
   0x8   :  { %s2964_s10 = scalar_lea.vmem %s27_s25, 3072  ;;  %p2969_p4 = scmp.lt.s32.totalorder %s27_s25, %s27_s25 }
   0x9   :  { %p2965_p3 = scmp.ne.s32.totalorder %s27_s25, %s2964_s10  ;;  %p2970_p5 = scmp.lt.s32.totalorder %s2964_s10, %s2964_s10 }
   0xb   :  { %p2971_p6 = por %p2970_p5, %p2969_p4 }
   0xd   :  { %p2972_p7 = pnand %p2971_p6, %p2965_p3 }
   0xf   :  { %2975 = shalt.err (!%p2972_p7)
}
  0x10   :  { %s3003_s11 = smov 384   ;;  %s3004_s12 = smov 24  }
  0x11   :  { %32 = dma.hbm_to_vmem [thread:$0]  %s3583_s3, 3072, %s27_s25, [#allocation3], %s3003_s11, %s3003_s11, %s3004_s12  }
  0x12   :  { %s3005_s15 = smov [#allocation4]   ;;  %s2976_s19 = scalar_lea.hbm %s3584_s4, 2560 }
  0x13   :  { %s38_s16 = sshll.u32 %s3005_s15, 4  ;;  %p2977_p8 = scmp.ne.s32.totalorder %s3584_s4, %s2976_s19  ;;  %s39_s16 = int_to_ptr.vmem [resolvable:$true] %s38_s16 }
  0x14   :  { %p2980_p9 = scmp.lt.u32.totalorder %s2976_s19, %s3584_s4 }
  0x16   :  { %p2982_p10 = pnand %p2980_p9, %p2977_p8 }
  0x18   :  { %2985 = shalt.err (!%p2982_p10)
}
  0x19   :  { %s2986_s24 = scalar_lea.vmem %s39_s16, 2560  ;;  %p2991_p12 = scmp.lt.s32.totalorder %s39_s16, %s39_s16 }
  0x1a   :  { %p2987_p11 = scmp.ne.s32.totalorder %s39_s16, %s2986_s24  ;;  %p2992_p13 = scmp.lt.s32.totalorder %s2986_s24, %s2986_s24 }
  0x1c   :  { %p2993_p0 = por %p2992_p13, %p2991_p12 }
  0x1e   :  { %p2994_p1 = pnand %p2993_p0, %p2987_p11 }
  0x20   :  { %2997 = shalt.err (!%p2994_p1)
}
  0x21   :  { %s3006_s3 = smov 128   ;;  %s3007_s25 = smov 8  }
  0x22   :  { %44 = dma.hbm_to_vmem [thread:$0]  %s3584_s4, 2560, %s39_s16, [#allocation5], %s3006_s3, %s3006_s3, %s3007_s25  }
  0x23   :  { %2998 = dma.done.wait [#allocation3], 3072  }
  0x24   :  { %2999 = vsyncadd [#allocation3], 4294964224 }
  0x25   :  { %3000 = dma.done.wait [#allocation5], 2560  }
  0x26   :  { %3001 = vsyncadd [#allocation5], 4294964736  ;;  %v3008_v0 = vmov 0.0   ;;  %v3082_v1 = vld [vmem:[%s3581_s1 + $0x8] sm:$0xff]  ;;  %v220_v3 = vld [vmem:[#allocation2 + $0x20] sm:$0xff]  ;;  %s3009_s30 = smov 32   ;;  %v201_v36 = vlaneseq }
  0x27   :  { %317 = vmatprep.mubr.f32.mxu1 %v3008_v0  ;;  %v217_v2 = vld [vmem:[#allocation2 + $0x8] sm:$0xff]  ;;  %244 = vrot.lane.b32.xlu0 %v3082_v1, %s3009_s30  ;;  %v216_v5 = vld [vmem:[#allocation2] sm:$0xff]  ;;  %v219_v6 = vld [vmem:[#allocation2 + $0x18] sm:$0xff]  ;;  %vm68_vm0 = vcmask 130048   ;;  %vm247_vm1 = vcmask 261120   ;;  %vm249_vm2 = vcmask 523264  }
  0x28   :  { %v3086_v4 = vpack.c.bf16 %v220_v3, %v217_v2  ;;  %v223_v7 = vld [vmem:[#allocation2 + $0x38] sm:$0xff]  ;;  %v3088_v8 = vpack.c.bf16 %v219_v6, %v216_v5  ;;  %v226_v9 = vld [vmem:[#allocation2 + $0x50] sm:$0xff]  ;;  %v225_v11 = vld [vmem:[#allocation2 + $0x48] sm:$0xff]  ;;  %v3149_v37 = vshrl.u32 %v201_v36, 7  ;;  %s3010_s17 = smov 64   ;;  %v3011_v60 = vmov 0.0|0.0  }
  0x29   :  { %v222_v10 = vld [vmem:[#allocation2 + $0x30] sm:$0xff]  ;;  %v3091_v12 = vpack.c.bf16 %v226_v9, %v223_v7  ;;  %v229_v13 = vld [vmem:[#allocation2 + $0x68] sm:$0xff]  ;;  %v232_v14 = vld [vmem:[#allocation2 + $0x80] sm:$0xff]  ;;  %vm3012_vm3 = vmmov 0   ;;  %s3013_s20 = smov 96  }
  0x2a   :  { %2576 = vmatprep.subr.bf16.mxu1 %v3086_v4  ;;  %v3094_v15 = vpack.c.bf16 %v225_v11, %v222_v10  ;;  %v62_v16 = vld [vmem:[%s3582_s2] sm:$0xff]  ;;  %v63_v17 = vld [vmem:[%s3582_s2 + $0x8] sm:$0xff]  ;;  %v3103_v18 = vpack.c.bf16 %v232_v14, %v229_v13  ;;  %v231_v20 = vld [vmem:[#allocation2 + $0x78] sm:$0xff]  ;;  %v203_v38 = vsub.s32 0, %v3149_v37 }
  0x2b   :  { %2578 = vmatpush1.bf16.msra.mxu1 %v3088_v8  ;;  %v228_v19 = vld [vmem:[#allocation2 + $0x60] sm:$0xff]  ;;  %v2571_v21 = vpack.c.bf16 %v63_v17, %v62_v16  ;;  %v235_v22 = vld [vmem:[#allocation2 + $0x98] sm:$0xff]  ;;  %v238_v23 = vld [vmem:[#allocation2 + $0xb0] sm:$0xff] }
  0x2c   :  { %2580 = vmatprep.subr.bf16.mxu1 %v3091_v12  ;;  %v54_v24 = vld [vmem:[%s3580_s0] sm:$0xff]  ;;  %v3110_v25 = vpack.c.bf16 %v231_v20, %v228_v19  ;;  %v55_v26 = vld [vmem:[%s3580_s0 + $0x8] sm:$0xff]  ;;  %v3116_v27 = vpack.c.bf16 %v238_v23, %v235_v22  ;;  %v234_v28 = vld [vmem:[#allocation2 + $0x90] sm:$0xff]  ;;  %v207_v20 = vsub.s32 1, %v3149_v37 }
  0x2d   :  { %2572 = vmatprep.subr.bf16.mxu0 %v2571_v21  ;;  %2361 = vmatprep.mubr.msk.f32.mxu0 %vm68_vm0, %v54_v24  ;;  %v237_v29 = vld [vmem:[#allocation2 + $0xa8] sm:$0xff]  ;;  %v240_v31 = vld [vmem:[%s3581_s1] sm:$0xff]  ;;  %v218_v63 = vld [vmem:[#allocation2 + $0x10] sm:$0xff] }
  0x2e   :  { %2574 = vmatpush3.bf16.msra.mxu0 %v2571_v21  ;;  %v3121_v30 = vpack.c.bf16 %v237_v29, %v234_v28  ;;  %v3155_v39 = vld [vmem:[%s3585_s5 + $0x1] ss:$4 sm:$0x7]  ;;  %v3165_v44 = vld [vmem:[%s3585_s5] ss:$0 sm:$0xff]  ;;  %v227_v7 = vld [vmem:[#allocation2 + $0x58] sm:$0xff] }
  0x2f   :  { %2582 = vmatpush1.bf16.msra.mxu1 %v3094_v15  ;;  %2620 = vmatprep.subr.bf16.mxu0 %v3086_v4  ;;  %v3158_v40 = vrot.slane %v3155_v39, %v203_v38  ;;  %v221_v2 = vld [vmem:[#allocation2 + $0x28] sm:$0xff]  ;;  %v224_v6 = vld [vmem:[#allocation2 + $0x40] sm:$0xff]  ;;  %v230_v11 = vld [vmem:[#allocation2 + $0x70] sm:$0xff]  ;;  %v3210_v21 = vrot.slane %v3155_v39, %v207_v20 }
  0x30   :  { %2584 = vmatprep.subr.bf16.mxu1 %v3103_v18  ;;  %v3177_v3 = vpack.c.bf16 %v221_v2, %v218_v63  ;;  %v3182_v10 = vpack.c.bf16 %v227_v7, %v224_v6  ;;  %v233_v13 = vld [vmem:[#allocation2 + $0x88] sm:$0xff]  ;;  %v236_v16 = vld [vmem:[#allocation2 + $0xa0] sm:$0xff]  ;;  %v239_v17 = vld [vmem:[#allocation2 + $0xb8] sm:$0xff] }
  0x31   :  { %2362 = vmatmul.mubr.msk.f32.vlgmr.msra.gmra.mrb[0].mxu0 %vm68_vm0, %v55_v26  ;;  %v3188_v14 = vpack.c.bf16 %v233_v13, %v230_v11  ;;  %v3192_v19 = vpack.c.bf16 %v239_v17, %v236_v16  ;;  %v56_v2 = vld [vmem:[%s3580_s0 + $0x10] sm:$0xff]  ;;  %v61_v7 = vld [vmem:[%s3580_s0 + $0x38] sm:$0xff] }
  0x32   :  { %2622 = vmatpush1.bf16.msra.mxu0 %v3088_v8  ;;  %2364 = vmatprep.mubr.msk.f32.mxu0 %vm68_vm0, %v56_v2  ;;  %v60_v6 = vld [vmem:[%s3580_s0 + $0x30] sm:$0xff] }
  0x33   :  { %2586 = vmatpush1.bf16.msra.mxu1 %v3110_v25  ;;  %2624 = vmatprep.subr.bf16.mxu0 %v3091_v12 }
  0x34   :  { %2588 = vmatprep.subr.bf16.mxu1 %v3116_v27 }
  0x36   :  { %2626 = vmatpush1.bf16.msra.mxu0 %v3094_v15 }
  0x37   :  { %2590 = vmatpush1.bf16.msra.mxu1 %v3121_v30  ;;  %2628 = vmatprep.subr.bf16.mxu0 %v3103_v18 }
  0x38   :  { %2592 = vmatprep.subr.bf16.mxu1 %v3086_v4 }
  0x3a   :  { %2630 = vmatpush1.bf16.msra.mxu0 %v3110_v25 }
  0x3b   :  { %2632 = vmatprep.subr.bf16.mxu0 %v3116_v27 }
  0x3e   :  { %2634 = vmatpush1.bf16.msra.mxu0 %v3121_v30 }
  0x3f   :  { %2648 = vmatprep.subr.bf16.mxu0 %v3086_v4 }
  0x99   :  { %v245_v32 = vpop.permute.xlu0 %244 }
  0x9a   :  { %v248_v33 = vsel %vm247_vm1, %v240_v31, %v245_v32 }
  0x9b   :  { %2216 = vmatmul.mubr.msk.f32.vlgmr.msra.gmra.mrb[0].mxu1 %vm249_vm2, %v248_v33 }
  0x9c   :  { %2594 = vmatpush1.bf16.msra.mxu1 %v3088_v8  ;;  %428 = vmatprep.mubr.f32.mxu1 %v3008_v0 }
  0x9d   :  { %2596 = vmatprep.subr.bf16.mxu1 %v3091_v12 }
  0xa0   :  { %2598 = vmatpush1.bf16.msra.mxu1 %v3094_v15 }
  0xa1   :  { %2600 = vmatprep.subr.bf16.mxu1 %v3103_v18 }
  0xa4   :  { %2602 = vmatpush1.bf16.msra.mxu1 %v3110_v25 }
  0xa5   :  { %2604 = vmatprep.subr.bf16.mxu1 %v3116_v27 }
  0xa8   :  { %2606 = vmatpush1.bf16.msra.mxu1 %v3121_v30 }
  0xa9   :  { %2607 = vmatprep.subr.bf16.mxu1 %v3011_v60 }
 0x104   :  { %v3147_v34 = vpop.f32.mrb[0].mxu0 }
 0x105   :  { %v159_v35 = vpop.f32.mrb[1].mxu0 }
 0x106   :  { %v160_v45 = vadd.f32 %v3165_v44, %v159_v35  ;;  %v165_v35 = vadd.f32 %v3147_v34, %v3165_v44 }
 0x16e   :  { %v319_v41 = vpop.f32.mrb[0].mxu1 }
 0x16f   :  { %v320_v42 = vadd.f32 %v319_v41, %v3158_v40  ;;  %v321_v43 = vpop.f32.mrb[1].mxu1 }
 0x171   :  { %331 = vrot.lane.b32.xlu0 %v320_v42, %s3010_s17  ;;  %v323_v46 = vadd.f32 %v320_v42, %v160_v45 }
 0x173   :  { %v2217_v47 = vmul.f32 -1.442695, %v323_v46 }
 0x175   :  { %2857 = vpow2.f32 %v2217_v47 }
 0x17f   :  { %v2858_v48 = vpop.eup %2857 }
 0x180   :  { %v327_v49 = vadd.f32 1.0, %v2858_v48 }
 0x182   :  { %2859 = vrcp.f32 %v327_v49 }
 0x18c   :  { %v2860_v50 = vpop.eup %2859 }
 0x1e3   :  { %v332_v51 = vpop.permute.xlu0 %331 }
 0x1e4   :  { %v334_v52 = vmul.f32 %v2860_v50, %v332_v51 }
 0x1e6   :  { %336 = vrot.lane.b32.xlu1 %v334_v52, %s3010_s17 }
 0x258   :  { %v337_v53 = vpop.permute.xlu1 %336 }
 0x259   :  { %v339_v54 = vadd.f32 %v337_v53, %v160_v45 }
 0x25b   :  { %2861 = vtanh.f32 %v339_v54 }
 0x265   :  { %v2862_v55 = vpop.eup %2861 }
 0x266   :  { %342 = vrot.lane.b32.xlu1 %v2862_v55, %s3010_s17 }
 0x2d8   :  { %v343_v56 = vpop.permute.xlu1 %342 }
 0x2d9   :  { %v345_v57 = vsub.f32 %v240_v31, %v343_v56  ;;  %v211_v31 = vsub.s32 2, %v3149_v37 }
 0x2db   :  { %347 = vrot.lane.b32.xlu0 %v345_v57, %s3009_s30 }
 0x34d   :  { %v348_v58 = vpop.permute.xlu0 %347 }
 0x34e   :  { %v350_v59 = vmul.f32 %v2860_v50, %v348_v58 }
 0x350   :  { %352 = vrot.lane.b32.xlu1 %v350_v59, %s3009_s30 }
 0x3c2   :  { %v353_v61 = vpop.permute.xlu1 %352 }
 0x3c3   :  { %v3173_v62 = vadd.f32 %v2862_v55, %v353_v61 }
 0x3c5   :  { %357 = vrot.lane.b32.xlu0 %v3173_v62, %s3010_s17 }
 0x437   :  { %v358_v5 = vpop.permute.xlu0 %357 }
 0x438   :  { %v360_v9 = vsel %vm247_vm1, %v358_v5, %v245_v32  ;;  %v3218_v32 = vrot.slane %v3155_v39, %v211_v31  ;;  %v58_v5 = vld [vmem:[%s3580_s0 + $0x20] sm:$0xff] }
 0x439   :  { %2218 = vmatmul.mubr.msk.f32.vlgmr.msra.gmra.mrb[2].mxu1 %vm249_vm2, %v360_v9 }
 0x43a   :  { %2609 = vmatpush3.bf16.msra.mxu1 %v3177_v3  ;;  %2389 = vmatprep.mubr.msk.f32.mxu1 %vm3012_vm3, %v3008_v0 }
 0x43b   :  { %2610 = vmatprep.subr.bf16.mxu1 %v3011_v60 }
 0x43e   :  { %2612 = vmatpush3.bf16.msra.mxu1 %v3182_v10 }
 0x43f   :  { %2613 = vmatprep.subr.bf16.mxu1 %v3011_v60 }
 0x442   :  { %2615 = vmatpush3.bf16.msra.mxu1 %v3188_v14 }
 0x443   :  { %2616 = vmatprep.subr.bf16.mxu1 %v3011_v60 }
 0x446   :  { %2618 = vmatpush3.bf16.msra.mxu1 %v3192_v19 }
 0x447   :  { %2635 = vmatprep.subr.bf16.mxu1 %v3011_v60 }
 0x449   :  { %2390 = vmatmul.mubr.msk.f32.vlgmr.msra.gmra.mrb[4].mxu1 %vm249_vm2, %v360_v9 }
 0x44a   :  { %2637 = vmatpush3.bf16.msra.mxu1 %v3177_v3  ;;  %2408 = vmatprep.mubr.msk.f32.mxu1 %vm3012_vm3, %v3008_v0 }
 0x44b   :  { %2638 = vmatprep.subr.bf16.mxu1 %v3011_v60 }
 0x44e   :  { %2640 = vmatpush3.bf16.msra.mxu1 %v3182_v10 }
 0x44f   :  { %2641 = vmatprep.subr.bf16.mxu1 %v3011_v60 }
 0x452   :  { %2643 = vmatpush3.bf16.msra.mxu1 %v3188_v14 }
 0x453   :  { %2644 = vmatprep.subr.bf16.mxu1 %v3011_v60 }
 0x456   :  { %2646 = vmatpush3.bf16.msra.mxu1 %v3192_v19 }
 0x457   :  { %2663 = vmatprep.subr.bf16.mxu1 %v3011_v60 }
 0x50c   :  { %v430_v22 = vpop.f32.mrb[2].mxu1 }
 0x50d   :  { %v431_v23 = vadd.f32 %v430_v22, %v3158_v40  ;;  %v432_v24 = vpop.f32.mrb[3].mxu1 }
 0x50e   :  { %v433_v26 = vadd.f32 %v432_v24, %v3210_v21 }
 0x50f   :  { %513 = vrot.lane.b32.xlu0 %v431_v23, %s3010_s17  ;;  %v505_v36 = vadd.f32 %v431_v23, %v165_v35 }
 0x510   :  { %542 = vrot.lane.b32.xlu1 %v433_v26, %s3010_s17 }
 0x511   :  { %v2220_v41 = vmul.f32 -1.442695, %v505_v36 }
 0x513   :  { %2863 = vpow2.f32 %v2220_v41 }
 0x51c   :  { %v501_v28 = vpop.f32.mrb[4].mxu1 }
 0x51d   :  { %v2391_v29 = vpop.f32.mrb[5].mxu1  ;;  %v502_v33 = vadd.f32 %v501_v28, %v3218_v32  ;;  %v2864_v43 = vpop.eup %2863 }
 0x51e   :  { %v509_v46 = vadd.f32 1.0, %v2864_v43 }
 0x51f   :  { %v534_v38 = vadd.f32 %v502_v33, %v433_v26 }
 0x521   :  { %v2221_v42 = vmul.f32 -1.442695, %v534_v38 }
 0x523   :  { %2865 = vpow2.f32 %v2221_v42 }
 0x524   :  { %2867 = vrcp.f32 %v509_v46 }
 0x52d   :  { %v2866_v45 = vpop.eup %2865 }
 0x52e   :  { %v538_v47 = vadd.f32 1.0, %v2866_v45  ;;  %v2868_v37 = vpop.eup %2867 }
 0x530   :  { %2869 = vrcp.f32 %v538_v47 }
 0x53a   :  { %v2870_v48 = vpop.eup %2869 }
 0x581   :  { %v514_v39 = vpop.permute.xlu0 %513 }
 0x582   :  { %v516_v49 = vmul.f32 %v2868_v37, %v514_v39  ;;  %v543_v50 = vpop.permute.xlu1 %542 }
 0x583   :  { %v545_v51 = vmul.f32 %v2870_v48, %v543_v50 }
 0x584   :  { %518 = vrot.lane.b32.xlu0 %v516_v49, %s3010_s17 }
 0x585   :  { %547 = vrot.lane.b32.xlu1 %v545_v51, %s3010_s17 }
 0x5f6   :  { %v519_v34 = vpop.permute.xlu0 %518 }
 0x5f7   :  { %v521_v52 = vadd.f32 %v519_v34, %v165_v35  ;;  %v548_v53 = vpop.permute.xlu1 %547 }
 0x5f8   :  { %v550_v54 = vadd.f32 %v548_v53, %v502_v33 }
 0x5f9   :  { %2871 = vtanh.f32 %v521_v52 }
 0x5fa   :  { %2873 = vtanh.f32 %v550_v54 }
 0x603   :  { %v2872_v55 = vpop.eup %2871 }
 0x604   :  { %v2874_v56 = vpop.eup %2873  ;;  %v523_v57 = vsub.f32 %v3173_v62, %v2872_v55  ;;  %v57_v62 = vld [vmem:[%s3580_s0 + $0x18] sm:$0xff] }
 0x605   :  { %553 = vrot.lane.b32.xlu1 %v2874_v56, %s3010_s17  ;;  %2365 = vmatmul.mubr.msk.f32.gmra.mrb[2].mxu0 %vm68_vm0, %v57_v62 }
 0x606   :  { %525 = vrot.lane.b32.xlu0 %v523_v57, %s3013_s20  ;;  %2367 = vmatprep.mubr.msk.f32.mxu0 %vm68_vm0, %v58_v5 }
 0x677   :  { %v554_v58 = vpop.permute.xlu1 %553 }
 0x678   :  { %v556_v59 = vsub.f32 %v3082_v1, %v554_v58  ;;  %v526_v61 = vpop.permute.xlu0 %525  ;;  %v59_v1 = vld [vmem:[%s3580_s0 + $0x28] sm:$0xff] }
 0x679   :  { %v528_v63 = vmul.f32 %v2868_v37, %v526_v61  ;;  %2368 = vmatmul.mubr.msk.f32.gmra.mrb[4].mxu0 %vm68_vm0, %v59_v1 }
 0x67a   :  { %558 = vrot.lane.b32.xlu1 %v556_v59, %s3009_s30  ;;  %2370 = vmatprep.mubr.msk.f32.mxu0 %vm68_vm0, %v60_v6 }
 0x67b   :  { %530 = vrot.lane.b32.xlu0 %v528_v63, %s3009_s30 }
 0x67d   :  { %2371 = vmatmul.mubr.msk.f32.gmra.mrb[6].mxu0 %vm68_vm0, %v61_v7 }
 0x67e   :  { %643 = vmatprep.mubr.f32.mxu0 %v3008_v0 }
 0x6d8   :  { %v3265_v22 = vpop.f32.mrb[2].mxu0 }
 0x6d9   :  { %v169_v23 = vpop.f32.mrb[3].mxu0 }
 0x6da   :  { %v170_v47 = vadd.f32 %v3165_v44, %v169_v23 }
 0x6ec   :  { %v559_v9 = vpop.permute.xlu1 %558 }
 0x6ed   :  { %v561_v11 = vmul.f32 %v2870_v48, %v559_v9  ;;  %v531_v13 = vpop.permute.xlu0 %530 }
 0x6ee   :  { %v3254_v16 = vadd.f32 %v2872_v55, %v531_v13 }
 0x6ef   :  { %563 = vrot.lane.b32.xlu1 %v561_v11, %s3009_s30 }
 0x6f0   :  { %568 = vrot.lane.b32.xlu0 %v3254_v16, %s3010_s17 }
 0x74c   :  { %v3267_v24 = vpop.f32.mrb[4].mxu0 }
 0x74d   :  { %v3269_v26 = vpop.f32.mrb[5].mxu0 }
 0x750   :  { %v3271_v28 = vpop.f32.mrb[6].mxu0 }
 0x751   :  { %v3273_v29 = vpop.f32.mrb[7].mxu0 }
 0x761   :  { %v564_v17 = vpop.permute.xlu1 %563 }
 0x762   :  { %v3261_v20 = vadd.f32 %v2874_v56, %v564_v17  ;;  %v569_v31 = vpop.permute.xlu0 %568 }
 0x764   :  { %572 = vrot.lane.b32.xlu1 %v3261_v20, %s3013_s20 }
 0x7d6   :  { %v573_v33 = vpop.permute.xlu1 %572 }
 0x7d7   :  { %v575_v35 = vsel %vm247_vm1, %v569_v31, %v573_v33 }
 0x7d8   :  { %2222 = vmatmul.mubr.msk.f32.vlgmr.msra.gmra.mrb[8].mxu0 %vm249_vm2, %v575_v35  ;;  %2409 = vmatmul.mubr.msk.f32.vlgmr.msra.gmra.mrb[6].mxu1 %vm249_vm2, %v575_v35 }
 0x7d9   :  { %2650 = vmatpush1.bf16.msra.mxu0 %v3088_v8  ;;  %2665 = vmatpush3.bf16.msra.mxu1 %v3177_v3 }
 0x7da   :  { %2652 = vmatprep.subr.bf16.mxu0 %v3091_v12  ;;  %2666 = vmatprep.subr.bf16.mxu1 %v3011_v60 }
 0x7db   :  { %854 = vmatprep.mubr.f32.mxu0 %v3008_v0  ;;  %2427 = vmatprep.mubr.msk.f32.mxu1 %vm3012_vm3, %v3008_v0 }
 0x7dd   :  { %2654 = vmatpush1.bf16.msra.mxu0 %v3094_v15  ;;  %2668 = vmatpush3.bf16.msra.mxu1 %v3182_v10 }
 0x7de   :  { %2656 = vmatprep.subr.bf16.mxu0 %v3103_v18  ;;  %2669 = vmatprep.subr.bf16.mxu1 %v3011_v60 }
 0x7e1   :  { %2658 = vmatpush1.bf16.msra.mxu0 %v3110_v25  ;;  %2671 = vmatpush3.bf16.msra.mxu1 %v3188_v14 }
 0x7e2   :  { %2660 = vmatprep.subr.bf16.mxu0 %v3116_v27  ;;  %2672 = vmatprep.subr.bf16.mxu1 %v3011_v60 }
 0x7e5   :  { %2662 = vmatpush1.bf16.msra.mxu0 %v3121_v30  ;;  %2674 = vmatpush3.bf16.msra.mxu1 %v3192_v19 }
 0x7e6   :  { %2676 = vmatprep.subr.bf16.mxu0 %v3086_v4  ;;  %2691 = vmatprep.subr.bf16.mxu1 %v3011_v60 }
 0x8ab   :  { %v645_v36 = vpop.f32.mrb[8].mxu0  ;;  %v716_v38 = vpop.f32.mrb[6].mxu1 }
 0x8ac   :  { %v646_v41 = vadd.f32 %v645_v36, %v3158_v40  ;;  %v647_v42 = vpop.f32.mrb[9].mxu0  ;;  %v2410_v43 = vpop.f32.mrb[7].mxu1  ;;  %v717_v46 = vadd.f32 %v716_v38, %v3218_v32 }
 0x8ad   :  { %v648_v45 = vadd.f32 %v647_v42, %v3210_v21 }
 0x8ae   :  { %728 = vrot.lane.b32.xlu0 %v646_v41, %s3010_s17  ;;  %v720_v37 = vadd.f32 %v646_v41, %v170_v47 }
 0x8af   :  { %757 = vrot.lane.b32.xlu1 %v648_v45, %s3010_s17  ;;  %v749_v39 = vadd.f32 %v717_v46, %v648_v45 }
 0x8b0   :  { %v2224_v48 = vmul.f32 -1.442695, %v720_v37 }
 0x8b1   :  { %v2225_v49 = vmul.f32 -1.442695, %v749_v39 }
 0x8b2   :  { %2875 = vpow2.f32 %v2224_v48 }
 0x8b3   :  { %2877 = vpow2.f32 %v2225_v49 }
 0x8bc   :  { %v2876_v50 = vpop.eup %2875 }
 0x8bd   :  { %v2878_v51 = vpop.eup %2877  ;;  %v724_v34 = vadd.f32 1.0, %v2876_v50 }
 0x8be   :  { %v753_v52 = vadd.f32 1.0, %v2878_v51 }
 0x8bf   :  { %2879 = vrcp.f32 %v724_v34 }
 0x8c0   :  { %2881 = vrcp.f32 %v753_v52 }
 0x8c9   :  { %v2880_v53 = vpop.eup %2879 }
 0x8ca   :  { %v2882_v55 = vpop.eup %2881 }
 0x920   :  { %v729_v54 = vpop.permute.xlu0 %728 }
 0x921   :  { %v731_v56 = vmul.f32 %v2880_v53, %v729_v54  ;;  %v758_v57 = vpop.permute.xlu1 %757 }
 0x922   :  { %v760_v58 = vmul.f32 %v2882_v55, %v758_v57 }
 0x923   :  { %733 = vrot.lane.b32.xlu0 %v731_v56, %s3010_s17 }
 0x924   :  { %762 = vrot.lane.b32.xlu1 %v760_v58, %s3010_s17 }
 0x995   :  { %v734_v59 = vpop.permute.xlu0 %733 }
 0x996   :  { %v736_v61 = vadd.f32 %v734_v59, %v170_v47  ;;  %v763_v63 = vpop.permute.xlu1 %762  ;;  %v175_v47 = vadd.f32 %v3265_v22, %v3165_v44 }
 0x997   :  { %v765_v2 = vadd.f32 %v763_v63, %v717_v46 }
 0x998   :  { %2883 = vtanh.f32 %v736_v61 }
 0x999   :  { %2885 = vtanh.f32 %v765_v2 }
 0x9a2   :  { %v2884_v62 = vpop.eup %2883 }
 0x9a3   :  { %v2886_v5 = vpop.eup %2885  ;;  %v738_v1 = vsub.f32 %v3254_v16, %v2884_v62 }
 0x9a4   :  { %v767_v6 = vsub.f32 %v3261_v20, %v2886_v5 }
 0x9a5   :  { %740 = vrot.lane.b32.xlu0 %v738_v1, %s3013_s20 }
 0x9a6   :  { %769 = vrot.lane.b32.xlu1 %v767_v6, %s3013_s20 }
 0xa17   :  { %v741_v7 = vpop.permute.xlu0 %740 }
 0xa18   :  { %v743_v9 = vmul.f32 %v2880_v53, %v741_v7  ;;  %v770_v11 = vpop.permute.xlu1 %769 }
 0xa19   :  { %v772_v13 = vmul.f32 %v2882_v55, %v770_v11 }
 0xa1a   :  { %745 = vrot.lane.b32.xlu0 %v743_v9, %s3009_s30 }
 0xa1b   :  { %774 = vrot.lane.b32.xlu1 %v772_v13, %s3009_s30 }
 0xa8c   :  { %v746_v17 = vpop.permute.xlu0 %745 }
 0xa8d   :  { %v3311_v23 = vadd.f32 %v2884_v62, %v746_v17  ;;  %v775_v31 = vpop.permute.xlu1 %774 }
 0xa8e   :  { %v3313_v33 = vadd.f32 %v2886_v5, %v775_v31 }
 0xa8f   :  { %779 = vrot.lane.b32.xlu0 %v3311_v23, %s3010_s17 }
 0xa90   :  { %783 = vrot.lane.b32.xlu1 %v3313_v33, %s3013_s20 }
 0xb01   :  { %v780_v16 = vpop.permute.xlu0 %779 }
 0xb02   :  { %v784_v20 = vpop.permute.xlu1 %783 }
 0xb03   :  { %v786_v35 = vsel %vm247_vm1, %v780_v16, %v784_v20 }
 0xb04   :  { %2226 = vmatmul.mubr.msk.f32.vlgmr.msra.gmra.mrb[10].mxu0 %vm249_vm2, %v786_v35  ;;  %2428 = vmatmul.mubr.msk.f32.vlgmr.msra.gmra.mrb[8].mxu1 %vm249_vm2, %v786_v35 }
 0xb05   :  { %2678 = vmatpush1.bf16.msra.mxu0 %v3088_v8  ;;  %2693 = vmatpush3.bf16.msra.mxu1 %v3177_v3 }
 0xb06   :  { %2680 = vmatprep.subr.bf16.mxu0 %v3091_v12  ;;  %2694 = vmatprep.subr.bf16.mxu1 %v3011_v60 }
 0xb07   :  { %1065 = vmatprep.mubr.f32.mxu0 %v3008_v0  ;;  %2446 = vmatprep.mubr.msk.f32.mxu1 %vm3012_vm3, %v3008_v0 }
 0xb09   :  { %2682 = vmatpush1.bf16.msra.mxu0 %v3094_v15  ;;  %2696 = vmatpush3.bf16.msra.mxu1 %v3182_v10 }
 0xb0a   :  { %2684 = vmatprep.subr.bf16.mxu0 %v3103_v18  ;;  %2697 = vmatprep.subr.bf16.mxu1 %v3011_v60 }
 0xb0d   :  { %2686 = vmatpush1.bf16.msra.mxu0 %v3110_v25  ;;  %2699 = vmatpush3.bf16.msra.mxu1 %v3188_v14 }
 0xb0e   :  { %2688 = vmatprep.subr.bf16.mxu0 %v3116_v27  ;;  %2700 = vmatprep.subr.bf16.mxu1 %v3011_v60 }
 0xb11   :  { %2690 = vmatpush1.bf16.msra.mxu0 %v3121_v30  ;;  %2702 = vmatpush3.bf16.msra.mxu1 %v3192_v19 }
 0xb12   :  { %2704 = vmatprep.subr.bf16.mxu0 %v3086_v4  ;;  %2719 = vmatprep.subr.bf16.mxu1 %v3011_v60 }
 0xbd7   :  { %v856_v36 = vpop.f32.mrb[10].mxu0  ;;  %v927_v38 = vpop.f32.mrb[8].mxu1 }
 0xbd8   :  { %v857_v41 = vadd.f32 %v856_v36, %v3158_v40  ;;  %v858_v42 = vpop.f32.mrb[11].mxu0  ;;  %v2429_v43 = vpop.f32.mrb[9].mxu1  ;;  %v928_v46 = vadd.f32 %v927_v38, %v3218_v32 }
 0xbd9   :  { %v859_v45 = vadd.f32 %v858_v42, %v3210_v21 }
 0xbda   :  { %939 = vrot.lane.b32.xlu0 %v857_v41, %s3010_s17  ;;  %v931_v37 = vadd.f32 %v857_v41, %v175_v47 }
 0xbdb   :  { %968 = vrot.lane.b32.xlu1 %v859_v45, %s3010_s17  ;;  %v960_v39 = vadd.f32 %v928_v46, %v859_v45 }
 0xbdc   :  { %v2228_v48 = vmul.f32 -1.442695, %v931_v37 }
 0xbdd   :  { %v2229_v49 = vmul.f32 -1.442695, %v960_v39 }
 0xbde   :  { %2887 = vpow2.f32 %v2228_v48 }
 0xbdf   :  { %2889 = vpow2.f32 %v2229_v49 }
 0xbe8   :  { %v2888_v50 = vpop.eup %2887 }
 0xbe9   :  { %v2890_v51 = vpop.eup %2889  ;;  %v935_v34 = vadd.f32 1.0, %v2888_v50 }
 0xbea   :  { %v964_v52 = vadd.f32 1.0, %v2890_v51 }
 0xbeb   :  { %2891 = vrcp.f32 %v935_v34 }
 0xbec   :  { %2893 = vrcp.f32 %v964_v52 }
 0xbf5   :  { %v2892_v53 = vpop.eup %2891 }
 0xbf6   :  { %v2894_v55 = vpop.eup %2893 }
 0xc4c   :  { %v940_v54 = vpop.permute.xlu0 %939 }
 0xc4d   :  { %v942_v56 = vmul.f32 %v2892_v53, %v940_v54  ;;  %v969_v57 = vpop.permute.xlu1 %968 }
 0xc4e   :  { %v971_v58 = vmul.f32 %v2894_v55, %v969_v57 }
 0xc4f   :  { %944 = vrot.lane.b32.xlu0 %v942_v56, %s3010_s17 }
 0xc50   :  { %973 = vrot.lane.b32.xlu1 %v971_v58, %s3010_s17 }
 0xcc1   :  { %v945_v22 = vpop.permute.xlu0 %944 }
 0xcc2   :  { %v947_v59 = vadd.f32 %v945_v22, %v175_v47  ;;  %v974_v61 = vpop.permute.xlu1 %973 }
 0xcc3   :  { %v976_v63 = vadd.f32 %v974_v61, %v928_v46  ;;  %v180_v46 = vadd.f32 %v3165_v44, %v3269_v26 }
 0xcc4   :  { %2895 = vtanh.f32 %v947_v59 }
 0xcc5   :  { %2897 = vtanh.f32 %v976_v63 }
 0xcce   :  { %v2896_v2 = vpop.eup %2895 }
 0xccf   :  { %v2898_v62 = vpop.eup %2897  ;;  %v949_v5 = vsub.f32 %v3311_v23, %v2896_v2 }
 0xcd0   :  { %v978_v1 = vsub.f32 %v3313_v33, %v2898_v62 }
 0xcd1   :  { %951 = vrot.lane.b32.xlu0 %v949_v5, %s3013_s20 }
 0xcd2   :  { %980 = vrot.lane.b32.xlu1 %v978_v1, %s3013_s20 }
 0xd43   :  { %v952_v6 = vpop.permute.xlu0 %951 }
 0xd44   :  { %v954_v7 = vmul.f32 %v2892_v53, %v952_v6  ;;  %v981_v9 = vpop.permute.xlu1 %980 }
 0xd45   :  { %v983_v11 = vmul.f32 %v2894_v55, %v981_v9 }
 0xd46   :  { %956 = vrot.lane.b32.xlu0 %v954_v7, %s3009_s30 }
 0xd47   :  { %985 = vrot.lane.b32.xlu1 %v983_v11, %s3009_s30 }
 0xdb8   :  { %v957_v13 = vpop.permute.xlu0 %956 }
 0xdb9   :  { %v3356_v17 = vadd.f32 %v2896_v2, %v957_v13  ;;  %v986_v31 = vpop.permute.xlu1 %985 }
 0xdba   :  { %v3358_v16 = vadd.f32 %v2898_v62, %v986_v31 }
 0xdbb   :  { %990 = vrot.lane.b32.xlu0 %v3356_v17, %s3010_s17 }
 0xdbc   :  { %994 = vrot.lane.b32.xlu1 %v3358_v16, %s3013_s20 }
 0xe2d   :  { %v991_v23 = vpop.permute.xlu0 %990 }
 0xe2e   :  { %v995_v33 = vpop.permute.xlu1 %994 }
 0xe2f   :  { %v997_v20 = vsel %vm247_vm1, %v991_v23, %v995_v33 }
 0xe30   :  { %2230 = vmatmul.mubr.msk.f32.vlgmr.msra.gmra.mrb[12].mxu0 %vm249_vm2, %v997_v20  ;;  %2447 = vmatmul.mubr.msk.f32.vlgmr.msra.gmra.mrb[10].mxu1 %vm249_vm2, %v997_v20 }
 0xe31   :  { %2706 = vmatpush1.bf16.msra.mxu0 %v3088_v8  ;;  %2721 = vmatpush3.bf16.msra.mxu1 %v3177_v3 }
 0xe32   :  { %2708 = vmatprep.subr.bf16.mxu0 %v3091_v12  ;;  %2722 = vmatprep.subr.bf16.mxu1 %v3011_v60 }
 0xe33   :  { %1276 = vmatprep.mubr.f32.mxu0 %v3008_v0  ;;  %2465 = vmatprep.mubr.msk.f32.mxu1 %vm3012_vm3, %v3008_v0 }
 0xe35   :  { %2710 = vmatpush1.bf16.msra.mxu0 %v3094_v15  ;;  %2724 = vmatpush3.bf16.msra.mxu1 %v3182_v10 }
 0xe36   :  { %2712 = vmatprep.subr.bf16.mxu0 %v3103_v18  ;;  %2725 = vmatprep.subr.bf16.mxu1 %v3011_v60 }
 0xe39   :  { %2714 = vmatpush1.bf16.msra.mxu0 %v3110_v25  ;;  %2727 = vmatpush3.bf16.msra.mxu1 %v3188_v14 }
 0xe3a   :  { %2716 = vmatprep.subr.bf16.mxu0 %v3116_v27  ;;  %2728 = vmatprep.subr.bf16.mxu1 %v3011_v60 }
 0xe3d   :  { %2718 = vmatpush1.bf16.msra.mxu0 %v3121_v30  ;;  %2730 = vmatpush3.bf16.msra.mxu1 %v3192_v19 }
 0xe3e   :  { %2732 = vmatprep.subr.bf16.mxu0 %v3086_v4  ;;  %2747 = vmatprep.subr.bf16.mxu1 %v3011_v60 }
 0xf03   :  { %v1067_v35 = vpop.f32.mrb[12].mxu0  ;;  %v1138_v36 = vpop.f32.mrb[10].mxu1 }
 0xf04   :  { %v1068_v38 = vadd.f32 %v1067_v35, %v3158_v40  ;;  %v1069_v41 = vpop.f32.mrb[13].mxu0  ;;  %v2448_v42 = vpop.f32.mrb[11].mxu1  ;;  %v1139_v45 = vadd.f32 %v1138_v36, %v3218_v32 }
 0xf05   :  { %v1070_v43 = vadd.f32 %v1069_v41, %v3210_v21 }
 0xf06   :  { %1150 = vrot.lane.b32.xlu0 %v1068_v38, %s3010_s17  ;;  %v1142_v47 = vadd.f32 %v1068_v38, %v180_v46 }
 0xf07   :  { %1179 = vrot.lane.b32.xlu1 %v1070_v43, %s3010_s17  ;;  %v1171_v37 = vadd.f32 %v1139_v45, %v1070_v43  ;;  %v185_v43 = vadd.f32 %v3267_v24, %v3165_v44 }
 0xf08   :  { %v2232_v39 = vmul.f32 -1.442695, %v1142_v47 }
 0xf09   :  { %v2233_v48 = vmul.f32 -1.442695, %v1171_v37 }
 0xf0a   :  { %2899 = vpow2.f32 %v2232_v39 }
 0xf0b   :  { %2901 = vpow2.f32 %v2233_v48 }
 0xf14   :  { %v2900_v49 = vpop.eup %2899 }
 0xf15   :  { %v2902_v50 = vpop.eup %2901  ;;  %v1146_v51 = vadd.f32 1.0, %v2900_v49 }
 0xf16   :  { %v1175_v34 = vadd.f32 1.0, %v2902_v50 }
 0xf17   :  { %2903 = vrcp.f32 %v1146_v51 }
 0xf18   :  { %2905 = vrcp.f32 %v1175_v34 }
 0xf21   :  { %v2904_v52 = vpop.eup %2903 }
 0xf22   :  { %v2906_v54 = vpop.eup %2905 }
 0xf78   :  { %v1151_v53 = vpop.permute.xlu0 %1150 }
 0xf79   :  { %v1153_v55 = vmul.f32 %v2904_v52, %v1151_v53  ;;  %v1180_v56 = vpop.permute.xlu1 %1179 }
 0xf7a   :  { %v1182_v57 = vmul.f32 %v2906_v54, %v1180_v56 }
 0xf7b   :  { %1155 = vrot.lane.b32.xlu0 %v1153_v55, %s3010_s17 }
 0xf7c   :  { %1184 = vrot.lane.b32.xlu1 %v1182_v57, %s3010_s17 }
 0xfed   :  { %v1156_v26 = vpop.permute.xlu0 %1155 }
 0xfee   :  { %v1158_v58 = vadd.f32 %v1156_v26, %v180_v46  ;;  %v1185_v22 = vpop.permute.xlu1 %1184 }
 0xfef   :  { %v1187_v59 = vadd.f32 %v1185_v22, %v1139_v45 }
 0xff0   :  { %2907 = vtanh.f32 %v1158_v58 }
 0xff1   :  { %2909 = vtanh.f32 %v1187_v59 }
 0xffa   :  { %v2908_v61 = vpop.eup %2907 }
 0xffb   :  { %v2910_v63 = vpop.eup %2909  ;;  %v1160_v2 = vsub.f32 %v3356_v17, %v2908_v61 }
 0xffc   :  { %v1189_v62 = vsub.f32 %v3358_v16, %v2910_v63 }
 0xffd   :  { %1162 = vrot.lane.b32.xlu0 %v1160_v2, %s3013_s20 }
 0xffe   :  { %1191 = vrot.lane.b32.xlu1 %v1189_v62, %s3013_s20 }
0x106f   :  { %v1163_v5 = vpop.permute.xlu0 %1162 }
0x1070   :  { %v1165_v1 = vmul.f32 %v2904_v52, %v1163_v5  ;;  %v1192_v6 = vpop.permute.xlu1 %1191 }
0x1071   :  { %v1194_v7 = vmul.f32 %v2906_v54, %v1192_v6 }
0x1072   :  { %1167 = vrot.lane.b32.xlu0 %v1165_v1, %s3009_s30 }
0x1073   :  { %1196 = vrot.lane.b32.xlu1 %v1194_v7, %s3009_s30 }
0x10e4   :  { %v1168_v9 = vpop.permute.xlu0 %1167 }
0x10e5   :  { %v3401_v11 = vadd.f32 %v2908_v61, %v1168_v9  ;;  %v1197_v13 = vpop.permute.xlu1 %1196 }
0x10e6   :  { %v3403_v31 = vadd.f32 %v2910_v63, %v1197_v13 }
0x10e7   :  { %1201 = vrot.lane.b32.xlu0 %v3401_v11, %s3010_s17 }
0x10e8   :  { %1205 = vrot.lane.b32.xlu1 %v3403_v31, %s3013_s20 }
0x1159   :  { %v1202_v17 = vpop.permute.xlu0 %1201 }
0x115a   :  { %v1206_v16 = vpop.permute.xlu1 %1205 }
0x115b   :  { %v1208_v23 = vsel %vm247_vm1, %v1202_v17, %v1206_v16 }
0x115c   :  { %2234 = vmatmul.mubr.msk.f32.vlgmr.msra.gmra.mrb[14].mxu0 %vm249_vm2, %v1208_v23  ;;  %2466 = vmatmul.mubr.msk.f32.vlgmr.msra.gmra.mrb[12].mxu1 %vm249_vm2, %v1208_v23 }
0x115d   :  { %2734 = vmatpush1.bf16.msra.mxu0 %v3088_v8  ;;  %2749 = vmatpush3.bf16.msra.mxu1 %v3177_v3 }
0x115e   :  { %2736 = vmatprep.subr.bf16.mxu0 %v3091_v12  ;;  %2750 = vmatprep.subr.bf16.mxu1 %v3011_v60 }
0x115f   :  { %1487 = vmatprep.mubr.f32.mxu0 %v3008_v0  ;;  %2484 = vmatprep.mubr.msk.f32.mxu1 %vm3012_vm3, %v3008_v0 }
0x1161   :  { %2738 = vmatpush1.bf16.msra.mxu0 %v3094_v15  ;;  %2752 = vmatpush3.bf16.msra.mxu1 %v3182_v10 }
0x1162   :  { %2740 = vmatprep.subr.bf16.mxu0 %v3103_v18  ;;  %2753 = vmatprep.subr.bf16.mxu1 %v3011_v60 }
0x1165   :  { %2742 = vmatpush1.bf16.msra.mxu0 %v3110_v25  ;;  %2755 = vmatpush3.bf16.msra.mxu1 %v3188_v14 }
0x1166   :  { %2744 = vmatprep.subr.bf16.mxu0 %v3116_v27  ;;  %2756 = vmatprep.subr.bf16.mxu1 %v3011_v60 }
0x1169   :  { %2746 = vmatpush1.bf16.msra.mxu0 %v3121_v30  ;;  %2758 = vmatpush3.bf16.msra.mxu1 %v3192_v19 }
0x116a   :  { %2760 = vmatprep.subr.bf16.mxu0 %v3086_v4  ;;  %2775 = vmatprep.subr.bf16.mxu1 %v3011_v60 }
0x122f   :  { %v1278_v33 = vpop.f32.mrb[14].mxu0  ;;  %v1349_v20 = vpop.f32.mrb[12].mxu1 }
0x1230   :  { %v1279_v35 = vadd.f32 %v1278_v33, %v3158_v40  ;;  %v1280_v36 = vpop.f32.mrb[15].mxu0  ;;  %v2467_v38 = vpop.f32.mrb[13].mxu1  ;;  %v1350_v42 = vadd.f32 %v1349_v20, %v3218_v32 }
0x1231   :  { %v1281_v41 = vadd.f32 %v1280_v36, %v3210_v21  ;;  %v190_v38 = vadd.f32 %v3165_v44, %v3273_v29 }
0x1232   :  { %1361 = vrot.lane.b32.xlu0 %v1279_v35, %s3010_s17  ;;  %v1353_v45 = vadd.f32 %v1279_v35, %v185_v43 }
0x1233   :  { %1390 = vrot.lane.b32.xlu1 %v1281_v41, %s3010_s17  ;;  %v1382_v46 = vadd.f32 %v1350_v42, %v1281_v41 }
0x1234   :  { %v2236_v47 = vmul.f32 -1.442695, %v1353_v45 }
0x1235   :  { %v2237_v37 = vmul.f32 -1.442695, %v1382_v46 }
0x1236   :  { %2911 = vpow2.f32 %v2236_v47 }
0x1237   :  { %2913 = vpow2.f32 %v2237_v37 }
0x1240   :  { %v2912_v39 = vpop.eup %2911 }
0x1241   :  { %v2914_v48 = vpop.eup %2913  ;;  %v1357_v49 = vadd.f32 1.0, %v2912_v39 }
0x1242   :  { %v1386_v50 = vadd.f32 1.0, %v2914_v48 }
0x1243   :  { %2915 = vrcp.f32 %v1357_v49 }
0x1244   :  { %2917 = vrcp.f32 %v1386_v50 }
0x124d   :  { %v2916_v51 = vpop.eup %2915 }
0x124e   :  { %v2918_v52 = vpop.eup %2917 }
0x12a4   :  { %v1362_v34 = vpop.permute.xlu0 %1361 }
0x12a5   :  { %v1364_v53 = vmul.f32 %v2916_v51, %v1362_v34  ;;  %v1391_v54 = vpop.permute.xlu1 %1390 }
0x12a6   :  { %v1393_v55 = vmul.f32 %v2918_v52, %v1391_v54 }
0x12a7   :  { %1366 = vrot.lane.b32.xlu0 %v1364_v53, %s3010_s17 }
0x12a8   :  { %1395 = vrot.lane.b32.xlu1 %v1393_v55, %s3010_s17 }
0x1319   :  { %v1367_v24 = vpop.permute.xlu0 %1366 }
0x131a   :  { %v1369_v56 = vadd.f32 %v1367_v24, %v185_v43  ;;  %v1396_v57 = vpop.permute.xlu1 %1395 }
0x131b   :  { %v1398_v26 = vadd.f32 %v1396_v57, %v1350_v42 }
0x131c   :  { %2919 = vtanh.f32 %v1369_v56 }
0x131d   :  { %2921 = vtanh.f32 %v1398_v26 }
0x1326   :  { %v2920_v58 = vpop.eup %2919 }
0x1327   :  { %v2922_v22 = vpop.eup %2921  ;;  %v1371_v59 = vsub.f32 %v3401_v11, %v2920_v58 }
0x1328   :  { %v1400_v61 = vsub.f32 %v3403_v31, %v2922_v22 }
0x1329   :  { %1373 = vrot.lane.b32.xlu0 %v1371_v59, %s3013_s20 }
0x132a   :  { %1402 = vrot.lane.b32.xlu1 %v1400_v61, %s3013_s20 }
0x139b   :  { %v1374_v63 = vpop.permute.xlu0 %1373 }
0x139c   :  { %v1376_v2 = vmul.f32 %v2916_v51, %v1374_v63  ;;  %v1403_v62 = vpop.permute.xlu1 %1402 }
0x139d   :  { %v1405_v5 = vmul.f32 %v2918_v52, %v1403_v62 }
0x139e   :  { %1378 = vrot.lane.b32.xlu0 %v1376_v2, %s3009_s30 }
0x139f   :  { %1407 = vrot.lane.b32.xlu1 %v1405_v5, %s3009_s30 }
0x1410   :  { %v1379_v1 = vpop.permute.xlu0 %1378 }
0x1411   :  { %v3446_v6 = vadd.f32 %v2920_v58, %v1379_v1  ;;  %v1408_v7 = vpop.permute.xlu1 %1407 }
0x1412   :  { %v3448_v9 = vadd.f32 %v2922_v22, %v1408_v7 }
0x1413   :  { %1412 = vrot.lane.b32.xlu0 %v3446_v6, %s3010_s17 }
0x1414   :  { %1416 = vrot.lane.b32.xlu1 %v3448_v9, %s3013_s20 }
0x1485   :  { %v1413_v11 = vpop.permute.xlu0 %1412 }
0x1486   :  { %v1417_v13 = vpop.permute.xlu1 %1416 }
0x1487   :  { %v1419_v31 = vsel %vm247_vm1, %v1413_v11, %v1417_v13 }
0x1488   :  { %2238 = vmatmul.mubr.msk.f32.vlgmr.msra.gmra.mrb[16].mxu0 %vm249_vm2, %v1419_v31  ;;  %2485 = vmatmul.mubr.msk.f32.vlgmr.msra.gmra.mrb[14].mxu1 %vm249_vm2, %v1419_v31 }
0x1489   :  { %2762 = vmatpush1.bf16.msra.mxu0 %v3088_v8  ;;  %2777 = vmatpush3.bf16.msra.mxu1 %v3177_v3 }
0x148a   :  { %2764 = vmatprep.subr.bf16.mxu0 %v3091_v12  ;;  %2778 = vmatprep.subr.bf16.mxu1 %v3011_v60 }
0x148b   :  { %1698 = vmatprep.mubr.f32.mxu0 %v3008_v0  ;;  %2503 = vmatprep.mubr.msk.f32.mxu1 %vm3012_vm3, %v3008_v0 }
0x148d   :  { %2766 = vmatpush1.bf16.msra.mxu0 %v3094_v15  ;;  %2780 = vmatpush3.bf16.msra.mxu1 %v3182_v10 }
0x148e   :  { %2768 = vmatprep.subr.bf16.mxu0 %v3103_v18  ;;  %2781 = vmatprep.subr.bf16.mxu1 %v3011_v60 }
0x1491   :  { %2770 = vmatpush1.bf16.msra.mxu0 %v3110_v25  ;;  %2783 = vmatpush3.bf16.msra.mxu1 %v3188_v14 }
0x1492   :  { %2772 = vmatprep.subr.bf16.mxu0 %v3116_v27  ;;  %2784 = vmatprep.subr.bf16.mxu1 %v3011_v60 }
0x1495   :  { %2774 = vmatpush1.bf16.msra.mxu0 %v3121_v30  ;;  %2786 = vmatpush3.bf16.msra.mxu1 %v3192_v19 }
0x1496   :  { %2788 = vmatprep.subr.bf16.mxu0 %v3086_v4  ;;  %2803 = vmatprep.subr.bf16.mxu1 %v3011_v60 }
0x155b   :  { %v1489_v17 = vpop.f32.mrb[16].mxu0  ;;  %v1560_v16 = vpop.f32.mrb[14].mxu1 }
0x155c   :  { %v1490_v23 = vadd.f32 %v1489_v17, %v3158_v40  ;;  %v1491_v33 = vpop.f32.mrb[17].mxu0  ;;  %v2486_v20 = vpop.f32.mrb[15].mxu1  ;;  %v1561_v36 = vadd.f32 %v1560_v16, %v3218_v32 }
0x155d   :  { %v1492_v35 = vadd.f32 %v1491_v33, %v3210_v21 }
0x155e   :  { %1572 = vrot.lane.b32.xlu0 %v1490_v23, %s3010_s17  ;;  %v1564_v4 = vadd.f32 %v1490_v23, %v190_v38 }
0x155f   :  { %1601 = vrot.lane.b32.xlu1 %v1492_v35, %s3010_s17  ;;  %v1593_v41 = vadd.f32 %v1561_v36, %v1492_v35 }
0x1560   :  { %v2240_v42 = vmul.f32 -1.442695, %v1564_v4 }
0x1561   :  { %v2241_v43 = vmul.f32 -1.442695, %v1593_v41 }
0x1562   :  { %2923 = vpow2.f32 %v2240_v42 }
0x1563   :  { %2925 = vpow2.f32 %v2241_v43 }
0x156c   :  { %v2924_v45 = vpop.eup %2923 }
0x156d   :  { %v2926_v46 = vpop.eup %2925  ;;  %v1568_v47 = vadd.f32 1.0, %v2924_v45 }
0x156e   :  { %v1597_v37 = vadd.f32 1.0, %v2926_v46 }
0x156f   :  { %2927 = vrcp.f32 %v1568_v47 }
0x1570   :  { %2929 = vrcp.f32 %v1597_v37 }
0x1579   :  { %v2928_v39 = vpop.eup %2927 }
0x157a   :  { %v2930_v49 = vpop.eup %2929 }
0x15d0   :  { %v1573_v48 = vpop.permute.xlu0 %1572 }
0x15d1   :  { %v1575_v50 = vmul.f32 %v2928_v39, %v1573_v48  ;;  %v1602_v51 = vpop.permute.xlu1 %1601 }
0x15d2   :  { %v1604_v34 = vmul.f32 %v2930_v49, %v1602_v51 }
0x15d3   :  { %1577 = vrot.lane.b32.xlu0 %v1575_v50, %s3010_s17 }
0x15d4   :  { %1606 = vrot.lane.b32.xlu1 %v1604_v34, %s3010_s17 }
0x1645   :  { %v1578_v44 = vpop.permute.xlu0 %1577 }
0x1646   :  { %v1580_v29 = vadd.f32 %v1578_v44, %v190_v38  ;;  %v1607_v52 = vpop.permute.xlu1 %1606 }
0x1647   :  { %v1609_v53 = vadd.f32 %v1607_v52, %v1561_v36 }
0x1648   :  { %2931 = vtanh.f32 %v1580_v29 }
0x1649   :  { %2933 = vtanh.f32 %v1609_v53 }
0x1652   :  { %v2932_v54 = vpop.eup %2931 }
0x1653   :  { %v2934_v55 = vpop.eup %2933  ;;  %v1582_v24 = vsub.f32 %v3446_v6, %v2932_v54 }
0x1654   :  { %v1611_v56 = vsub.f32 %v3448_v9, %v2934_v55 }
0x1655   :  { %1584 = vrot.lane.b32.xlu0 %v1582_v24, %s3013_s20 }
0x1656   :  { %1613 = vrot.lane.b32.xlu1 %v1611_v56, %s3013_s20 }
0x16c7   :  { %v1585_v57 = vpop.permute.xlu0 %1584 }
0x16c8   :  { %v1587_v26 = vmul.f32 %v2928_v39, %v1585_v57  ;;  %v1614_v58 = vpop.permute.xlu1 %1613 }
0x16c9   :  { %v1616_v22 = vmul.f32 %v2930_v49, %v1614_v58 }
0x16ca   :  { %1589 = vrot.lane.b32.xlu0 %v1587_v26, %s3009_s30 }
0x16cb   :  { %1618 = vrot.lane.b32.xlu1 %v1616_v22, %s3009_s30 }
0x173c   :  { %v1590_v59 = vpop.permute.xlu0 %1589 }
0x173d   :  { %v3491_v61 = vadd.f32 %v2932_v54, %v1590_v59  ;;  %v1619_v63 = vpop.permute.xlu1 %1618 }
0x173e   :  { %v3493_v2 = vadd.f32 %v2934_v55, %v1619_v63 }
0x173f   :  { %1623 = vrot.lane.b32.xlu0 %v3491_v61, %s3010_s17 }
0x1740   :  { %1627 = vrot.lane.b32.xlu1 %v3493_v2, %s3013_s20 }
0x17b1   :  { %v1624_v62 = vpop.permute.xlu0 %1623 }
0x17b2   :  { %v1628_v5 = vpop.permute.xlu1 %1627 }
0x17b3   :  { %v1630_v1 = vsel %vm247_vm1, %v1624_v62, %v1628_v5  ;;  %v2021_v5 = vld [vmem:[#allocation4] sm:$0xff] }
0x17b4   :  { %2242 = vmatmul.mubr.msk.f32.vlgmr.msra.gmra.mrb[18].mxu0 %vm249_vm2, %v1630_v1  ;;  %2504 = vmatmul.mubr.msk.f32.vlgmr.msra.gmra.mrb[16].mxu1 %vm249_vm2, %v1630_v1  ;;  %v2023_v1 = vld [vmem:[#allocation4 + $0x10] sm:$0xff] }
0x17b5   :  { %2790 = vmatpush1.bf16.msra.mxu0 %v3088_v8  ;;  %2805 = vmatpush3.bf16.msra.mxu1 %v3177_v3 }
0x17b6   :  { %2792 = vmatprep.subr.bf16.mxu0 %v3091_v12  ;;  %2806 = vmatprep.subr.bf16.mxu1 %v3011_v60 }
0x17b7   :  { %1909 = vmatprep.mubr.f32.mxu0 %v3008_v0  ;;  %2522 = vmatprep.mubr.msk.f32.mxu1 %vm3012_vm3, %v3008_v0 }
0x17b9   :  { %2794 = vmatpush1.bf16.msra.mxu0 %v3094_v15  ;;  %2808 = vmatpush3.bf16.msra.mxu1 %v3182_v10 }
0x17ba   :  { %2796 = vmatprep.subr.bf16.mxu0 %v3103_v18  ;;  %2809 = vmatprep.subr.bf16.mxu1 %v3011_v60 }
0x17bd   :  { %2798 = vmatpush1.bf16.msra.mxu0 %v3110_v25  ;;  %2811 = vmatpush3.bf16.msra.mxu1 %v3188_v14 }
0x17be   :  { %2800 = vmatprep.subr.bf16.mxu0 %v3116_v27  ;;  %2812 = vmatprep.subr.bf16.mxu1 %v3011_v60 }
0x17c1   :  { %2802 = vmatpush1.bf16.msra.mxu0 %v3121_v30  ;;  %2814 = vmatpush3.bf16.msra.mxu1 %v3192_v19  ;;  %v2953_v30 = vld [vmem:[%s3585_s5] ss:$0 sm:$0xff] }
0x17c2   :  { %2815 = vmatprep.subr.bf16.mxu0 %v3011_v60  ;;  %v195_v10 = vadd.f32 %v2953_v30, %v3271_v28  ;;  %v2025_v30 = vld [vmem:[#allocation4 + $0x20] sm:$0xff] }
0x1887   :  { %v1700_v8 = vpop.f32.mrb[18].mxu0  ;;  %v1771_v12 = vpop.f32.mrb[16].mxu1 }
0x1888   :  { %v1701_v15 = vadd.f32 %v1700_v8, %v3158_v40  ;;  %v1702_v18 = vpop.f32.mrb[19].mxu0  ;;  %v2505_v3 = vpop.f32.mrb[17].mxu1  ;;  %v1772_v27 = vadd.f32 %v1771_v12, %v3218_v32  ;;  %v2024_v12 = vld [vmem:[#allocation4 + $0x18] sm:$0xff] }
0x1889   :  { %v1703_v25 = vadd.f32 %v1702_v18, %v3210_v21 }
0x188a   :  { %1783 = vrot.lane.b32.xlu0 %v1701_v15, %s3010_s17  ;;  %v1775_v14 = vadd.f32 %v1701_v15, %v195_v10  ;;  %v2819_v15 = vpack.c.bf16 %v2024_v12, %v2023_v1 }
0x188b   :  { %1812 = vrot.lane.b32.xlu1 %v1703_v25, %s3010_s17  ;;  %v1804_v19 = vadd.f32 %v1772_v27, %v1703_v25 }
0x188c   :  { %v2244_v6 = vmul.f32 -1.442695, %v1775_v14 }
0x188d   :  { %v2245_v40 = vmul.f32 -1.442695, %v1804_v19  ;;  %v2027_v19 = vld [vmem:[#allocation4 + $0x30] sm:$0xff] }
0x188e   :  { %2935 = vpow2.f32 %v2244_v6  ;;  %v2028_v6 = vld [vmem:[#allocation4 + $0x38] sm:$0xff] }
0x188f   :  { %2937 = vpow2.f32 %v2245_v40 }
0x1898   :  { %v2936_v7 = vpop.eup %2935 }
0x1899   :  { %v2938_v9 = vpop.eup %2937  ;;  %v1779_v11 = vadd.f32 1.0, %v2936_v7  ;;  %v2825_v7 = vpack.c.bf16 %v2028_v6, %v2027_v19 }
0x189a   :  { %v1808_v13 = vadd.f32 1.0, %v2938_v9  ;;  %v2029_v9 = vld [vmem:[#allocation4 + $0x40] sm:$0xff] }
0x189b   :  { %2939 = vrcp.f32 %v1779_v11  ;;  %v2030_v11 = vld [vmem:[#allocation4 + $0x48] sm:$0xff] }
0x189c   :  { %2941 = vrcp.f32 %v1808_v13  ;;  %v2828_v13 = vpack.c.bf16 %v2030_v11, %v2029_v9 }
0x18a5   :  { %v2940_v31 = vpop.eup %2939 }
0x18a6   :  { %v2942_v16 = vpop.eup %2941 }
0x18fc   :  { %v1784_v17 = vpop.permute.xlu0 %1783 }
0x18fd   :  { %v1786_v23 = vmul.f32 %v2940_v31, %v1784_v17  ;;  %v1813_v33 = vpop.permute.xlu1 %1812  ;;  %v2032_v17 = vld [vmem:[#allocation4 + $0x58] sm:$0xff] }
0x18fe   :  { %v1815_v20 = vmul.f32 %v2942_v16, %v1813_v33  ;;  %v2034_v33 = vld [vmem:[#allocation4 + $0x68] sm:$0xff] }
0x18ff   :  { %1788 = vrot.lane.b32.xlu0 %v1786_v23, %s3010_s17  ;;  %v2033_v23 = vld [vmem:[#allocation4 + $0x60] sm:$0xff] }
0x1900   :  { %1817 = vrot.lane.b32.xlu1 %v1815_v20, %s3010_s17  ;;  %v2834_v20 = vpack.c.bf16 %v2034_v33, %v2033_v23 }
0x1971   :  { %v1789_v28 = vpop.permute.xlu0 %1788 }
0x1972   :  { %v1791_v35 = vadd.f32 %v1789_v28, %v195_v10  ;;  %v1818_v36 = vpop.permute.xlu1 %1817  ;;  %v2026_v10 = vld [vmem:[#allocation4 + $0x28] sm:$0xff]  ;;  %v2036_v28 = vld [vmem:[#allocation4 + $0x78] sm:$0xff] }
0x1973   :  { %v1820_v38 = vadd.f32 %v1818_v36, %v1772_v27  ;;  %v2822_v14 = vpack.c.bf16 %v2026_v10, %v2025_v30  ;;  %v2037_v36 = vld [vmem:[#allocation4 + $0x80] sm:$0xff] }
0x1974   :  { %2943 = vtanh.f32 %v1791_v35 }
0x1975   :  { %2945 = vtanh.f32 %v1820_v38  ;;  %v2038_v38 = vld [vmem:[#allocation4 + $0x88] sm:$0xff] }
0x197e   :  { %v2944_v4 = vpop.eup %2943 }
0x197f   :  { %v2946_v41 = vpop.eup %2945  ;;  %v1793_v42 = vsub.f32 %v3491_v61, %v2944_v4 }
0x1980   :  { %v1822_v43 = vsub.f32 %v3493_v2, %v2946_v41 }
0x1981   :  { %1795 = vrot.lane.b32.xlu0 %v1793_v42, %s3013_s20  ;;  %v2040_v42 = vld [vmem:[#allocation4 + $0x98] sm:$0xff] }
0x1982   :  { %1824 = vrot.lane.b32.xlu1 %v1822_v43, %s3013_s20 }
0x19f3   :  { %v1796_v45 = vpop.permute.xlu0 %1795 }
0x19f4   :  { %v1798_v46 = vmul.f32 %v2940_v31, %v1796_v45  ;;  %v1825_v47 = vpop.permute.xlu1 %1824  ;;  %v2031_v31 = vld [vmem:[#allocation4 + $0x50] sm:$0xff]  ;;  %v2250_v45 = vld [vmem:[%s3585_s5 + $0x2] ss:$0 sm:$0xff] }
0x19f5   :  { %v1827_v37 = vmul.f32 %v2942_v16, %v1825_v47  ;;  %v2831_v16 = vpack.c.bf16 %v2032_v17, %v2031_v31 }
0x19f6   :  { %1800 = vrot.lane.b32.xlu0 %v1798_v46, %s3009_s30 }
0x19f7   :  { %1829 = vrot.lane.b32.xlu1 %v1827_v37, %s3009_s30 }
0x1a68   :  { %v1801_v39 = vpop.permute.xlu0 %1800 }
0x1a69   :  { %v1803_v48 = vadd.f32 %v2944_v4, %v1801_v39  ;;  %v1830_v49 = vpop.permute.xlu1 %1829  ;;  %v2840_v4 = vpack.c.bf16 %v2038_v38, %v2037_v36 }
0x1a6a   :  { %v1832_v50 = vadd.f32 %v2946_v41, %v1830_v49  ;;  %v2039_v41 = vld [vmem:[#allocation4 + $0x90] sm:$0xff] }
0x1a6b   :  { %1834 = vrot.lane.b32.xlu0 %v1803_v48, %s3010_s17  ;;  %v2843_v43 = vpack.c.bf16 %v2040_v42, %v2039_v41  ;;  %v2252_v48 = vld [vmem:[%s3585_s5 + $0x3] ss:$0 sm:$0xff] }
0x1a6c   :  { %1838 = vrot.lane.b32.xlu1 %v1832_v50, %s3013_s20 }
0x1add   :  { %v1835_v51 = vpop.permute.xlu0 %1834 }
0x1ade   :  { %2014 = vst.msk [vmem:[%s3587_s7] sm:$0xff] %vm247_vm1, %v1835_v51  ;;  %v1839_v34 = vpop.permute.xlu1 %1838 }
0x1adf   :  { %v1841_v44 = vsel %vm247_vm1, %v1835_v51, %v1839_v34 }
0x1ae0   :  { %2246 = vmatmul.mubr.msk.f32.vlgmr.msra.gmra.mrb[20].mxu0 %vm249_vm2, %v1841_v44  ;;  %2523 = vmatmul.mubr.msk.f32.vlgmr.msra.gmra.mrb[18].mxu1 %vm249_vm2, %v1841_v44 }
0x1ae1   :  { %2533 = vmatprep.mubr.msk.f32.mxu0 %vm3012_vm3, %v3008_v0 }
0x1bb3   :  { %v1911_v29 = vpop.f32.mrb[20].mxu0  ;;  %v1981_v52 = vpop.f32.mrb[18].mxu1 }
0x1bb4   :  { %v1912_v53 = vpop.f32.mrb[21].mxu0  ;;  %v2524_v54 = vpop.f32.mrb[19].mxu1  ;;  %v1982_v24 = vadd.f32 %v1981_v52, %v3218_v32  ;;  %v2022_v32 = vld [vmem:[#allocation4 + $0x8] sm:$0xff] }
0x1bb5   :  { %v1913_v55 = vadd.f32 %v1912_v53, %v3210_v21  ;;  %v2816_v8 = vpack.c.bf16 %v2022_v32, %v2021_v5 }
0x1bb7   :  { %1993 = vrot.lane.b32.xlu0 %v1913_v55, %s3010_s17  ;;  %v1985_v56 = vadd.f32 %v1982_v24, %v1913_v55  ;;  %2817 = vmatpush3.bf16.msra.mxu0 %v2816_v8 }
0x1bb8   :  { %2818 = vmatprep.subr.bf16.mxu0 %v3011_v60 }
0x1bb9   :  { %v2248_v57 = vmul.f32 -1.442695, %v1985_v56 }
0x1bbb   :  { %2947 = vpow2.f32 %v2248_v57  ;;  %2820 = vmatpush3.bf16.msra.mxu0 %v2819_v15 }
0x1bbc   :  { %2821 = vmatprep.subr.bf16.mxu0 %v3011_v60 }
0x1bc5   :  { %v2948_v26 = vpop.eup %2947 }
0x1bc6   :  { %v1989_v58 = vadd.f32 1.0, %v2948_v26 }
0x1bc8   :  { %2949 = vrcp.f32 %v1989_v58 }
0x1bd2   :  { %v2950_v22 = vpop.eup %2949 }
0x1c29   :  { %v1994_v59 = vpop.permute.xlu0 %1993 }
0x1c2a   :  { %v1996_v61 = vmul.f32 %v2950_v22, %v1994_v59 }
0x1c2c   :  { %1998 = vrot.lane.b32.xlu1 %v1996_v61, %s3010_s17 }
0x1c9e   :  { %v1999_v63 = vpop.permute.xlu1 %1998 }
0x1c9f   :  { %v2001_v2 = vadd.f32 %v1999_v63, %v1982_v24 }
0x1ca1   :  { %2951 = vtanh.f32 %v2001_v2 }
0x1cab   :  { %v2952_v62 = vpop.eup %2951 }
0x1cac   :  { %v2003_v21 = vsub.f32 %v1832_v50, %v2952_v62 }
0x1cae   :  { %2005 = vrot.lane.b32.xlu0 %v2003_v21, %s3013_s20 }
0x1d20   :  { %v2006_v18 = vpop.permute.xlu0 %2005 }
0x1d21   :  { %v2008_v3 = vmul.f32 %v2950_v22, %v2006_v18 }
0x1d23   :  { %2010 = vrot.lane.b32.xlu1 %v2008_v3, %s3009_s30 }
0x1d95   :  { %v2011_v25 = vpop.permute.xlu1 %2010 }
0x1d96   :  { %v2013_v27 = vadd.f32 %v2952_v62, %v2011_v25 }
0x1d98   :  { %2016 = vrot.lane.b32.xlu0 %v2013_v27, %s3010_s17 }
0x1e0a   :  { %v2017_v40 = vpop.permute.xlu0 %2016 }
0x1e0b   :  { %2249 = vst.msk [vmem:[%s3587_s7 + $0x8] sm:$0xff] %vm247_vm1, %v2017_v40  ;;  %2534 = vmatmul.mubr.msk.f32.vlgmr.msra.gmra.mrb[22].mxu0 %vm247_vm1, %v2017_v40 }
0x1e0c   :  { %2823 = vmatpush3.bf16.msra.mxu0 %v2822_v14  ;;  %2568 = vmatprep.mubr.msk.f32.mxu0 %vm3012_vm3, %v3008_v0  ;;  %v2035_v0 = vld [vmem:[#allocation4 + $0x70] sm:$0xff] }
0x1e0d   :  { %2824 = vmatprep.subr.bf16.mxu0 %v3011_v60  ;;  %v2837_v35 = vpack.c.bf16 %v2036_v28, %v2035_v0 }
0x1e10   :  { %2826 = vmatpush3.bf16.msra.mxu0 %v2825_v7 }
0x1e11   :  { %2827 = vmatprep.subr.bf16.mxu0 %v3011_v60 }
0x1e14   :  { %2829 = vmatpush3.bf16.msra.mxu0 %v2828_v13 }
0x1e15   :  { %2830 = vmatprep.subr.bf16.mxu0 %v3011_v60 }
0x1e18   :  { %2832 = vmatpush3.bf16.msra.mxu0 %v2831_v16 }
0x1e19   :  { %2833 = vmatprep.subr.bf16.mxu0 %v3011_v60 }
0x1e1c   :  { %2835 = vmatpush3.bf16.msra.mxu0 %v2834_v20 }
0x1e1d   :  { %2836 = vmatprep.subr.bf16.mxu0 %v3011_v60 }
0x1e20   :  { %2838 = vmatpush3.bf16.msra.mxu0 %v2837_v35 }
0x1e21   :  { %2839 = vmatprep.subr.bf16.mxu0 %v3011_v60 }
0x1e24   :  { %2841 = vmatpush3.bf16.msra.mxu0 %v2840_v4 }
0x1e25   :  { %2842 = vmatprep.subr.bf16.mxu0 %v3011_v60 }
0x1e28   :  { %2844 = vmatpush3.bf16.msra.mxu0 %v2843_v43 }
0x1ede   :  { %v2115_v46 = vpop.f32.mrb[22].mxu0 }
0x1edf   :  { %v2116_v47 = vadd.f32 %v2250_v45, %v2115_v46  ;;  %v2535_v37 = vpop.f32.mrb[23].mxu0 }
0x1ee1   :  { %v2119_v39 = vmax.f32 %v2116_v47, 0.0 }
0x1ee3   :  { %2569 = vmatmul.mubr.f32.vlgmr.msra.gmra.mrb[24].mxu0 %v2119_v39 }
0x1fb6   :  { %v2190_v49 = vpop.f32.mrb[24].mxu0 }
0x1fb7   :  { %v2191_v50 = vadd.f32 %v2252_v48, %v2190_v49  ;;  %v2570_v60 = vpop.f32.mrb[25].mxu0 }
0x1fb9   :  { %2194 = vst [vmem:[%s3586_s6] sm:$0xff] %v2191_v50 }
0x1fba   :  { %2203 = vsyncpa [#allocation3], 1 }
0x1fbb   :  { %2204 = vsyncpa [#allocation5], 1 }

</bundles_post_ra>
